<compile_context>
chip_gen: v5e
topology: v5e:2x2
jax: 0.10.0
libtpu: 0.0.40
codegen_flags: <defaults>
</compile_context>

<pallas_src>
import jax
import jax.numpy as jnp
from jax import lax
from jax.experimental import pallas as pl
from jax.experimental.pallas import tpu as pltpu

KSIZE = 7
PAD = (KSIZE - 1) // 2
_LANES = 128
_TARGET_BLOCK_BYTES = 4 << 20          # ~4 MiB f32 input block per grid step
_VMEM_LIMIT = 32 * 1024 * 1024         # proven scoped-VMEM limit, fits 4 MiB blocks
_ACC_TARGET_ELEMS = 8 * 1024           # ~8 f32 vregs of live accumulator per band


def _largest_divisor_at_most(n, cap):
    cap = max(1, min(n, cap))
    for d in range(cap, 0, -1):
        if n % d == 0:
            return d
    return 1


def _band_rows(h, elems_per_row):
    """Rows per accumulator band so the live band fits comfortably in vregs."""
    return _largest_divisor_at_most(h, max(1, _ACC_TARGET_ELEMS // max(1, elems_per_row)))


def _num_tensorcores():
    """Best-effort TensorCores per chip (v4 / v7x megacore -> 2)."""
    try:
        dev = jax.devices()[0]
        n = getattr(dev, "num_cores", None)
        if isinstance(n, int) and n > 0:
            return n
        kind = str(getattr(dev, "device_kind", "")).lower()
        if "v4" in kind or "v7" in kind or "7x" in kind:
            return 2
    except Exception:
        pass
    return 1


# ----------------------------------------------------------------------------
# Kernel A: batch on the lane axis (lane-dense for small W, larger batch).
# ----------------------------------------------------------------------------
def _sa_kernel_batch_minor(w_ref, x_ref, o_ref, xp_ref):
    # w_ref : (49,)           SMEM  flat 7x7 conv taps
    # x_ref : (H, W, NB)      VMEM  input tile   (batch rides the 128 lanes)
    # o_ref : (H, W, NB)      VMEM  output tile  (lane-dense store)
    # xp_ref: (H+6, W+6, NB)  VMEM  zero-padded scratch
    H, W, NB = x_ref.shape

    # Zero only the 3-wide halo frame (cheap; safe under megacore "parallel").
    zr = jnp.zeros((PAD, W + 2 * PAD, NB), jnp.float32)
    xp_ref[0:PAD, :, :] = zr
    xp_ref[PAD + H:2 * PAD + H, :, :] = zr
    zc = jnp.zeros((H + 2 * PAD, PAD, NB), jnp.float32)
    xp_ref[:, 0:PAD, :] = zc
    xp_ref[:, PAD + W:2 * PAD + W, :] = zc

    # Interior straight from x_ref (x is not kept live across the tap loop).
    xp_ref[PAD:PAD + H, PAD:PAD + W, :] = x_ref[...].astype(jnp.float32)

    hb = _band_rows(H, W * NB)
    n_bands = H // hb

    def band_at(r0):
        acc = None
        for kj in range(KSIZE):
            # One sublane-offset load per kj; the 7 ki taps are then plain
            # outer-dim slices of a register value (no relayouts at all).
            plane = xp_ref[pl.ds(r0, hb + 2 * PAD), kj:kj + W, :]
            for ki in range(KSIZE):
                t = w_ref[ki * KSIZE + kj] * plane[ki:ki + hb, :, :]
                acc = t if acc is None else acc + t
        y = jax.nn.sigmoid(acc)                       # EUP transcendental
        xin = x_ref[pl.ds(r0, hb), :, :].astype(jnp.float32)
        o_ref[pl.ds(r0, hb), :, :] = (xin * y).astype(o_ref.dtype)

    if n_bands == 1:
        band_at(0)
    else:
        def body(b, carry):
            band_at(pl.multiple_of(b * hb, hb))
            return carry
        lax.fori_loop(0, n_bands, body, 0)


# ----------------------------------------------------------------------------
# Kernel B: W on the lane axis (small batch, or large W).
# ----------------------------------------------------------------------------
def _sa_kernel_w_minor(w_ref, x_ref, o_ref, xp_ref):
    # w_ref : (49,)           SMEM
    # x_ref : (NB, H, W)      VMEM
    # o_ref : (NB, H, W)      VMEM
    # xp_ref: (NB, H+6, W+6)  VMEM  zero-padded scratch
    NB, H, W = x_ref.shape

    zr = jnp.zeros((NB, PAD, W + 2 * PAD), jnp.float32)
    xp_ref[:, 0:PAD, :] = zr
    xp_ref[:, PAD + H:2 * PAD + H, :] = zr
    zc = jnp.zeros((NB, H + 2 * PAD, PAD), jnp.float32)
    xp_ref[:, :, 0:PAD] = zc
    xp_ref[:, :, PAD + W:2 * PAD + W] = zc

    xp_ref[:, PAD:PAD + H, PAD:PAD + W] = x_ref[...].astype(jnp.float32)

    hb = _band_rows(H, NB * W)
    n_bands = H // hb

    def band_at(r0):
        acc = None
        for kj in range(KSIZE):
            # Hoist the lane (kj) shift: one relayout per kj per band; the ki
            # taps are sublane slices of the already-loaded plane.
            plane = xp_ref[:, pl.ds(r0, hb + 2 * PAD), kj:kj + W]
            for ki in range(KSIZE):
                t = w_ref[ki * KSIZE + kj] * plane[:, ki:ki + hb, :]
                acc = t if acc is None else acc + t
        y = jax.nn.sigmoid(acc)
        xin = x_ref[:, pl.ds(r0, hb), :].astype(jnp.float32)
        o_ref[:, pl.ds(r0, hb), :] = (xin * y).astype(o_ref.dtype)

    if n_bands == 1:
        band_at(0)
    else:
        def body(b, carry):
            band_at(pl.multiple_of(b * hb, hb))
            return carry
        lax.fori_loop(0, n_bands, body, 0)


# ----------------------------------------------------------------------------
# Block-size heuristics.
# ----------------------------------------------------------------------------
def _pick_nb_batch_minor(n, h, w, num_cores):
    cap = max(1, _TARGET_BLOCK_BYTES // (h * w * 4))
    cap128 = max(_LANES, (cap // _LANES) * _LANES)
    if num_cores <= 1 or n < 2 * _LANES:
        # Single TensorCore (or too little batch to split): one block if it
        # fits -> no wrapper-side batch padding at all.
        return n if n <= cap else cap128
    nb = max(_LANES, ((n // num_cores) // _LANES) * _LANES)
    return min(nb, cap128)


def _pick_nb_w_minor(n, h, w, num_cores):
    cap = max(1, _TARGET_BLOCK_BYTES // (h * w * 4))
    nb = min(n, cap)
    if num_cores > 1:
        while nb > 1 and pl.cdiv(n, nb) < num_cores:
            nb -= 1
    # Prefer a block count that divides n exactly (avoids a wrapper-side pad,
    # i.e. an extra HBM round-trip of x).
    d = _largest_divisor_at_most(n, nb)
    return d if d >= max(1, nb // 2) else nb


# ----------------------------------------------------------------------------
# Wrapper.
# ----------------------------------------------------------------------------
@jax.jit
def spatial_attention(x_nchw, weight):
    """x_nchw: (N, 1, H, W); weight: (1, 1, 7, 7).  Matches the torch module."""
    N, C, H, W = x_nchw.shape
    assert C == 1, "SpatialAttention conv has in_channels=1"
    x = x_nchw.reshape(N, H, W)
    w = weight.reshape(KSIZE * KSIZE).astype(jnp.float32)

    num_cores = _num_tensorcores()
    cap = max(1, _TARGET_BLOCK_BYTES // (H * W * 4))
    # Lane-dense layout choice: the minor (128-lane) axis should be whichever
    # axis can actually fill it.  Batch-on-lanes only if it fits VMEM legally.
    use_batch_minor = (
        W < _LANES
        and min(N, _LANES) > min(W, _LANES)
        and (N <= cap or cap >= _LANES)
    )

    common_params = pltpu.CompilerParams(
        dimension_semantics=("parallel",),
        vmem_limit_bytes=_VMEM_LIMIT,
    )

    if use_batch_minor:
        nb = _pick_nb_batch_minor(N, H, W, num_cores)
        n_blocks = pl.cdiv(N, nb)
        Np = n_blocks * nb
        # Layout plumbing: lane-dense (H, W, N) slabs for input and output.
        xt = jnp.transpose(x, (1, 2, 0))
        if Np != N:
            xt = jnp.pad(xt, ((0, 0), (0, 0), (0, Np - N)))
        out_t = pl.pallas_call(
            _sa_kernel_batch_minor,
            out_shape=jax.ShapeDtypeStruct((H, W, Np), x.dtype),
            grid_spec=pltpu.PrefetchScalarGridSpec(
                num_scalar_prefetch=0,
                grid=(n_blocks,),
                in_specs=[
                    pl.BlockSpec(memory_space=pltpu.MemorySpace.SMEM),  # 49 taps
                    pl.BlockSpec((H, W, nb), lambda n: (0, 0, n)),
                ],
                out_specs=pl.BlockSpec((H, W, nb), lambda n: (0, 0, n)),
                scratch_shapes=[
                    pltpu.VMEM((H + 2 * PAD, W + 2 * PAD, nb), jnp.float32),
                ],
            ),
            compiler_params=common_params,
        )(w, xt)
        out = jnp.transpose(out_t, (2, 0, 1))
        if Np != N:
            out = out[:N]
    else:
        nb = _pick_nb_w_minor(N, H, W, num_cores)
        n_blocks = pl.cdiv(N, nb)
        Np = n_blocks * nb
        xi = x if Np == N else jnp.pad(x, ((0, Np - N), (0, 0), (0, 0)))
        out = pl.pallas_call(
            _sa_kernel_w_minor,
            out_shape=jax.ShapeDtypeStruct((Np, H, W), x.dtype),
            grid_spec=pltpu.PrefetchScalarGridSpec(
                num_scalar_prefetch=0,
                grid=(n_blocks,),
                in_specs=[
                    pl.BlockSpec(memory_space=pltpu.MemorySpace.SMEM),  # 49 taps
                    pl.BlockSpec((nb, H, W), lambda n: (n, 0, 0)),
                ],
                out_specs=pl.BlockSpec((nb, H, W), lambda n: (n, 0, 0)),
                scratch_shapes=[
                    pltpu.VMEM((nb, H + 2 * PAD, W + 2 * PAD), jnp.float32),
                ],
            ),
            compiler_params=common_params,
        )(w, xi)
        if Np != N:
            out = out[:N]

    return out.reshape(N, 1, H, W)


def spatial_attention_ref(x_nchw, weight):
    """Pure-JAX reference (torch Conv2d NCHW cross-correlation, pad=3, no bias)."""
    y = jax.lax.conv_general_dilated(
        x_nchw, weight,
        window_strides=(1, 1),
        padding=((PAD, PAD), (PAD, PAD)),
        dimension_numbers=("NCHW", "OIHW", "NCHW"),
    )
    return x_nchw * jax.nn.sigmoid(y)


if __name__ == "__main__":
    key = jax.random.PRNGKey(0)
    kx1, kx2, kw = jax.random.split(key, 3)
    weight = (jax.random.uniform(kw, (1, 1, KSIZE, KSIZE), dtype=jnp.float32)
              - 0.5) * (2.0 / KSIZE)

    # Small batch (W-on-lanes path): N=2, C=1, H=W=16.
    x1 = jax.random.normal(kx1, (2, 1, 16, 16), dtype=jnp.float32)
    out1 = jax.block_until_ready(spatial_attention(x1, weight))
    ref1 = spatial_attention_ref(x1, weight)
    assert out1.shape == x1.shape and out1.dtype == x1.dtype
    assert jnp.allclose(out1, ref1, atol=1e-5, rtol=1e-5), "mismatch (small batch)"

    # Larger batch (lane-dense batch-on-lanes path): N=130, H=W=16.
    x2 = jax.random.normal(kx2, (130, 1, 16, 16), dtype=jnp.float32)
    out2 = jax.block_until_ready(spatial_attention(x2, weight))
    ref2 = spatial_attention_ref(x2, weight)
    assert out2.shape == x2.shape and out2.dtype == x2.dtype
    assert jnp.allclose(out2, ref2, atol=1e-5, rtol=1e-5), "mismatch (large batch)"

    print("KERNEL_OK")
</pallas_src>

<mosaic_0001>
module attributes {stable_mosaic.version = 11 : i64} {
  func.func @_sa_kernel_w_minor(%arg0: i32, %arg1: memref<49xf32, #tpu.memory_space<smem>>, %arg2: memref<2x16x16xf32, #tpu.memory_space<vmem>>, %arg3: memref<2x16x16xf32, #tpu.memory_space<vmem>>, %arg4: memref<2x22x22xf32, #tpu.memory_space<vmem>>) attributes {dimension_semantics = [#tpu.dimension_semantics<parallel>], iteration_bounds = array<i64: 1>, scalar_prefetch = 0 : i64, scratch_operands = 1 : i64, tpu.core_type = #tpu.core_type<tc>, window_params = [{transform_indices = @transform_0, window_bounds = array<i64: 49>}, {transform_indices = @transform_1, window_bounds = array<i64: 2, 16, 16>}, {transform_indices = @transform_2, window_bounds = array<i64: 2, 16, 16>}]} {
    %cst = arith.constant 0.000000e+00 : f32
    %0 = vector.broadcast %cst : f32 to vector<2x3x22xf32>
    %c0 = arith.constant 0 : index
    %c0_0 = arith.constant 0 : index
    %c0_1 = arith.constant 0 : index
    %1 = vector.load %arg4[%c0, %c0_0, %c0_1] : memref<2x22x22xf32, #tpu.memory_space<vmem>>, vector<2x3x22xf32>
    tpu.vector_store %arg4[%c0, %c0_0, %c0_1], %0 {strides = array<i32>} : memref<2x22x22xf32, #tpu.memory_space<vmem>>, vector<2x3x22xf32>,
    %c0_2 = arith.constant 0 : index
    %c19 = arith.constant 19 : index
    %c0_3 = arith.constant 0 : index
    %2 = vector.load %arg4[%c0_2, %c19, %c0_3] : memref<2x22x22xf32, #tpu.memory_space<vmem>>, vector<2x3x22xf32>
    tpu.vector_store %arg4[%c0_2, %c19, %c0_3], %0 {strides = array<i32>} : memref<2x22x22xf32, #tpu.memory_space<vmem>>, vector<2x3x22xf32>,
    %cst_4 = arith.constant 0.000000e+00 : f32
    %3 = vector.broadcast %cst_4 : f32 to vector<2x22x3xf32>
    %c0_5 = arith.constant 0 : index
    %c0_6 = arith.constant 0 : index
    %c0_7 = arith.constant 0 : index
    %4 = vector.load %arg4[%c0_5, %c0_6, %c0_7] : memref<2x22x22xf32, #tpu.memory_space<vmem>>, vector<2x22x3xf32>
    tpu.vector_store %arg4[%c0_5, %c0_6, %c0_7], %3 {strides = array<i32>} : memref<2x22x22xf32, #tpu.memory_space<vmem>>, vector<2x22x3xf32>,
    %c0_8 = arith.constant 0 : index
    %c0_9 = arith.constant 0 : index
    %c19_10 = arith.constant 19 : index
    %5 = vector.load %arg4[%c0_8, %c0_9, %c19_10] : memref<2x22x22xf32, #tpu.memory_space<vmem>>, vector<2x22x3xf32>
    tpu.vector_store %arg4[%c0_8, %c0_9, %c19_10], %3 {strides = array<i32>} : memref<2x22x22xf32, #tpu.memory_space<vmem>>, vector<2x22x3xf32>,
    %c0_11 = arith.constant 0 : index
    %c0_12 = arith.constant 0 : index
    %c0_13 = arith.constant 0 : index
    %6 = vector.load %arg2[%c0_11, %c0_12, %c0_13] : memref<2x16x16xf32, #tpu.memory_space<vmem>>, vector<2x16x16xf32>
    %c0_14 = arith.constant 0 : index
    %c3 = arith.constant 3 : index
    %c3_15 = arith.constant 3 : index
    %7 = vector.load %arg4[%c0_14, %c3, %c3_15] : memref<2x22x22xf32, #tpu.memory_space<vmem>>, vector<2x16x16xf32>
    tpu.vector_store %arg4[%c0_14, %c3, %c3_15], %6 {strides = array<i32>} : memref<2x22x22xf32, #tpu.memory_space<vmem>>, vector<2x16x16xf32>,
    %c0_16 = arith.constant 0 : index
    %c0_17 = arith.constant 0 : index
    %c0_18 = arith.constant 0 : index
    %8 = vector.load %arg4[%c0_16, %c0_17, %c0_18] : memref<2x22x22xf32, #tpu.memory_space<vmem>>, vector<2x22x16xf32>
    %c0_19 = arith.constant 0 : index
    %9 = memref.load %arg1[%c0_19] : memref<49xf32, #tpu.memory_space<smem>>
    %10 = vector.extract_strided_slice %8 {offsets = [0, 0, 0], sizes = [2, 16, 16], strides = [1, 1, 1]} : vector<2x22x16xf32> to vector<2x16x16xf32>
    %11 = vector.broadcast %9 : f32 to vector<2x16x16xf32>
    %12 = arith.mulf %11, %10 : vector<2x16x16xf32>
    %c7 = arith.constant 7 : index
    %13 = memref.load %arg1[%c7] : memref<49xf32, #tpu.memory_space<smem>>
    %14 = vector.extract_strided_slice %8 {offsets = [0, 1, 0], sizes = [2, 16, 16], strides = [1, 1, 1]} : vector<2x22x16xf32> to vector<2x16x16xf32>
    %15 = vector.broadcast %13 : f32 to vector<2x16x16xf32>
    %16 = arith.mulf %15, %14 : vector<2x16x16xf32>
    %17 = arith.addf %12, %16 : vector<2x16x16xf32>
    %c14 = arith.constant 14 : index
    %18 = memref.load %arg1[%c14] : memref<49xf32, #tpu.memory_space<smem>>
    %19 = vector.extract_strided_slice %8 {offsets = [0, 2, 0], sizes = [2, 16, 16], strides = [1, 1, 1]} : vector<2x22x16xf32> to vector<2x16x16xf32>
    %20 = vector.broadcast %18 : f32 to vector<2x16x16xf32>
    %21 = arith.mulf %20, %19 : vector<2x16x16xf32>
    %22 = arith.addf %17, %21 : vector<2x16x16xf32>
    %c21 = arith.constant 21 : index
    %23 = memref.load %arg1[%c21] : memref<49xf32, #tpu.memory_space<smem>>
    %24 = vector.extract_strided_slice %8 {offsets = [0, 3, 0], sizes = [2, 16, 16], strides = [1, 1, 1]} : vector<2x22x16xf32> to vector<2x16x16xf32>
    %25 = vector.broadcast %23 : f32 to vector<2x16x16xf32>
    %26 = arith.mulf %25, %24 : vector<2x16x16xf32>
    %27 = arith.addf %22, %26 : vector<2x16x16xf32>
    %c28 = arith.constant 28 : index
    %28 = memref.load %arg1[%c28] : memref<49xf32, #tpu.memory_space<smem>>
    %29 = vector.extract_strided_slice %8 {offsets = [0, 4, 0], sizes = [2, 16, 16], strides = [1, 1, 1]} : vector<2x22x16xf32> to vector<2x16x16xf32>
    %30 = vector.broadcast %28 : f32 to vector<2x16x16xf32>
    %31 = arith.mulf %30, %29 : vector<2x16x16xf32>
    %32 = arith.addf %27, %31 : vector<2x16x16xf32>
    %c35 = arith.constant 35 : index
    %33 = memref.load %arg1[%c35] : memref<49xf32, #tpu.memory_space<smem>>
    %34 = vector.extract_strided_slice %8 {offsets = [0, 5, 0], sizes = [2, 16, 16], strides = [1, 1, 1]} : vector<2x22x16xf32> to vector<2x16x16xf32>
    %35 = vector.broadcast %33 : f32 to vector<2x16x16xf32>
    %36 = arith.mulf %35, %34 : vector<2x16x16xf32>
    %37 = arith.addf %32, %36 : vector<2x16x16xf32>
    %c42 = arith.constant 42 : index
    %38 = memref.load %arg1[%c42] : memref<49xf32, #tpu.memory_space<smem>>
    %39 = vector.extract_strided_slice %8 {offsets = [0, 6, 0], sizes = [2, 16, 16], strides = [1, 1, 1]} : vector<2x22x16xf32> to vector<2x16x16xf32>
    %40 = vector.broadcast %38 : f32 to vector<2x16x16xf32>
    %41 = arith.mulf %40, %39 : vector<2x16x16xf32>
    %42 = arith.addf %37, %41 : vector<2x16x16xf32>
    %c0_20 = arith.constant 0 : index
    %c0_21 = arith.constant 0 : index
    %c1 = arith.constant 1 : index
    %43 = vector.load %arg4[%c0_20, %c0_21, %c1] : memref<2x22x22xf32, #tpu.memory_space<vmem>>, vector<2x22x16xf32>
    %c1_22 = arith.constant 1 : index
    %44 = memref.load %arg1[%c1_22] : memref<49xf32, #tpu.memory_space<smem>>
    %45 = vector.extract_strided_slice %43 {offsets = [0, 0, 0], sizes = [2, 16, 16], strides = [1, 1, 1]} : vector<2x22x16xf32> to vector<2x16x16xf32>
    %46 = vector.broadcast %44 : f32 to vector<2x16x16xf32>
    %47 = arith.mulf %46, %45 : vector<2x16x16xf32>
    %48 = arith.addf %42, %47 : vector<2x16x16xf32>
    %c8 = arith.constant 8 : index
    %49 = memref.load %arg1[%c8] : memref<49xf32, #tpu.memory_space<smem>>
    %50 = vector.extract_strided_slice %43 {offsets = [0, 1, 0], sizes = [2, 16, 16], strides = [1, 1, 1]} : vector<2x22x16xf32> to vector<2x16x16xf32>
    %51 = vector.broadcast %49 : f32 to vector<2x16x16xf32>
    %52 = arith.mulf %51, %50 : vector<2x16x16xf32>
    %53 = arith.addf %48, %52 : vector<2x16x16xf32>
    %c15 = arith.constant 15 : index
    %54 = memref.load %arg1[%c15] : memref<49xf32, #tpu.memory_space<smem>>
    %55 = vector.extract_strided_slice %43 {offsets = [0, 2, 0], sizes = [2, 16, 16], strides = [1, 1, 1]} : vector<2x22x16xf32> to vector<2x16x16xf32>
    %56 = vector.broadcast %54 : f32 to vector<2x16x16xf32>
    %57 = arith.mulf %56, %55 : vector<2x16x16xf32>
    %58 = arith.addf %53, %57 : vector<2x16x16xf32>
    %c22 = arith.constant 22 : index
    %59 = memref.load %arg1[%c22] : memref<49xf32, #tpu.memory_space<smem>>
    %60 = vector.extract_strided_slice %43 {offsets = [0, 3, 0], sizes = [2, 16, 16], strides = [1, 1, 1]} : vector<2x22x16xf32> to vector<2x16x16xf32>
    %61 = vector.broadcast %59 : f32 to vector<2x16x16xf32>
    %62 = arith.mulf %61, %60 : vector<2x16x16xf32>
    %63 = arith.addf %58, %62 : vector<2x16x16xf32>
    %c29 = arith.constant 29 : index
    %64 = memref.load %arg1[%c29] : memref<49xf32, #tpu.memory_space<smem>>
    %65 = vector.extract_strided_slice %43 {offsets = [0, 4, 0], sizes = [2, 16, 16], strides = [1, 1, 1]} : vector<2x22x16xf32> to vector<2x16x16xf32>
    %66 = vector.broadcast %64 : f32 to vector<2x16x16xf32>
    %67 = arith.mulf %66, %65 : vector<2x16x16xf32>
    %68 = arith.addf %63, %67 : vector<2x16x16xf32>
    %c36 = arith.constant 36 : index
    %69 = memref.load %arg1[%c36] : memref<49xf32, #tpu.memory_space<smem>>
    %70 = vector.extract_strided_slice %43 {offsets = [0, 5, 0], sizes = [2, 16, 16], strides = [1, 1, 1]} : vector<2x22x16xf32> to vector<2x16x16xf32>
    %71 = vector.broadcast %69 : f32 to vector<2x16x16xf32>
    %72 = arith.mulf %71, %70 : vector<2x16x16xf32>
    %73 = arith.addf %68, %72 : vector<2x16x16xf32>
    %c43 = arith.constant 43 : index
    %74 = memref.load %arg1[%c43] : memref<49xf32, #tpu.memory_space<smem>>
    %75 = vector.extract_strided_slice %43 {offsets = [0, 6, 0], sizes = [2, 16, 16], strides = [1, 1, 1]} : vector<2x22x16xf32> to vector<2x16x16xf32>
    %76 = vector.broadcast %74 : f32 to vector<2x16x16xf32>
    %77 = arith.mulf %76, %75 : vector<2x16x16xf32>
    %78 = arith.addf %73, %77 : vector<2x16x16xf32>
    %c0_23 = arith.constant 0 : index
    %c0_24 = arith.constant 0 : index
    %c2 = arith.constant 2 : index
    %79 = vector.load %arg4[%c0_23, %c0_24, %c2] : memref<2x22x22xf32, #tpu.memory_space<vmem>>, vector<2x22x16xf32>
    %c2_25 = arith.constant 2 : index
    %80 = memref.load %arg1[%c2_25] : memref<49xf32, #tpu.memory_space<smem>>
    %81 = vector.extract_strided_slice %79 {offsets = [0, 0, 0], sizes = [2, 16, 16], strides = [1, 1, 1]} : vector<2x22x16xf32> to vector<2x16x16xf32>
    %82 = vector.broadcast %80 : f32 to vector<2x16x16xf32>
    %83 = arith.mulf %82, %81 : vector<2x16x16xf32>
    %84 = arith.addf %78, %83 : vector<2x16x16xf32>
    %c9 = arith.constant 9 : index
    %85 = memref.load %arg1[%c9] : memref<49xf32, #tpu.memory_space<smem>>
    %86 = vector.extract_strided_slice %79 {offsets = [0, 1, 0], sizes = [2, 16, 16], strides = [1, 1, 1]} : vector<2x22x16xf32> to vector<2x16x16xf32>
    %87 = vector.broadcast %85 : f32 to vector<2x16x16xf32>
    %88 = arith.mulf %87, %86 : vector<2x16x16xf32>
    %89 = arith.addf %84, %88 : vector<2x16x16xf32>
    %c16 = arith.constant 16 : index
    %90 = memref.load %arg1[%c16] : memref<49xf32, #tpu.memory_space<smem>>
    %91 = vector.extract_strided_slice %79 {offsets = [0, 2, 0], sizes = [2, 16, 16], strides = [1, 1, 1]} : vector<2x22x16xf32> to vector<2x16x16xf32>
    %92 = vector.broadcast %90 : f32 to vector<2x16x16xf32>
    %93 = arith.mulf %92, %91 : vector<2x16x16xf32>
    %94 = arith.addf %89, %93 : vector<2x16x16xf32>
    %c23 = arith.constant 23 : index
    %95 = memref.load %arg1[%c23] : memref<49xf32, #tpu.memory_space<smem>>
    %96 = vector.extract_strided_slice %79 {offsets = [0, 3, 0], sizes = [2, 16, 16], strides = [1, 1, 1]} : vector<2x22x16xf32> to vector<2x16x16xf32>
    %97 = vector.broadcast %95 : f32 to vector<2x16x16xf32>
    %98 = arith.mulf %97, %96 : vector<2x16x16xf32>
    %99 = arith.addf %94, %98 : vector<2x16x16xf32>
    %c30 = arith.constant 30 : index
    %100 = memref.load %arg1[%c30] : memref<49xf32, #tpu.memory_space<smem>>
    %101 = vector.extract_strided_slice %79 {offsets = [0, 4, 0], sizes = [2, 16, 16], strides = [1, 1, 1]} : vector<2x22x16xf32> to vector<2x16x16xf32>
    %102 = vector.broadcast %100 : f32 to vector<2x16x16xf32>
    %103 = arith.mulf %102, %101 : vector<2x16x16xf32>
    %104 = arith.addf %99, %103 : vector<2x16x16xf32>
    %c37 = arith.constant 37 : index
    %105 = memref.load %arg1[%c37] : memref<49xf32, #tpu.memory_space<smem>>
    %106 = vector.extract_strided_slice %79 {offsets = [0, 5, 0], sizes = [2, 16, 16], strides = [1, 1, 1]} : vector<2x22x16xf32> to vector<2x16x16xf32>
    %107 = vector.broadcast %105 : f32 to vector<2x16x16xf32>
    %108 = arith.mulf %107, %106 : vector<2x16x16xf32>
    %109 = arith.addf %104, %108 : vector<2x16x16xf32>
    %c44 = arith.constant 44 : index
    %110 = memref.load %arg1[%c44] : memref<49xf32, #tpu.memory_space<smem>>
    %111 = vector.extract_strided_slice %79 {offsets = [0, 6, 0], sizes = [2, 16, 16], strides = [1, 1, 1]} : vector<2x22x16xf32> to vector<2x16x16xf32>
    %112 = vector.broadcast %110 : f32 to vector<2x16x16xf32>
    %113 = arith.mulf %112, %111 : vector<2x16x16xf32>
    %114 = arith.addf %109, %113 : vector<2x16x16xf32>
    %c0_26 = arith.constant 0 : index
    %c0_27 = arith.constant 0 : index
    %c3_28 = arith.constant 3 : index
    %115 = vector.load %arg4[%c0_26, %c0_27, %c3_28] : memref<2x22x22xf32, #tpu.memory_space<vmem>>, vector<2x22x16xf32>
    %c3_29 = arith.constant 3 : index
    %116 = memref.load %arg1[%c3_29] : memref<49xf32, #tpu.memory_space<smem>>
    %117 = vector.extract_strided_slice %115 {offsets = [0, 0, 0], sizes = [2, 16, 16], strides = [1, 1, 1]} : vector<2x22x16xf32> to vector<2x16x16xf32>
    %118 = vector.broadcast %116 : f32 to vector<2x16x16xf32>
    %119 = arith.mulf %118, %117 : vector<2x16x16xf32>
    %120 = arith.addf %114, %119 : vector<2x16x16xf32>
    %c10 = arith.constant 10 : index
    %121 = memref.load %arg1[%c10] : memref<49xf32, #tpu.memory_space<smem>>
    %122 = vector.extract_strided_slice %115 {offsets = [0, 1, 0], sizes = [2, 16, 16], strides = [1, 1, 1]} : vector<2x22x16xf32> to vector<2x16x16xf32>
    %123 = vector.broadcast %121 : f32 to vector<2x16x16xf32>
    %124 = arith.mulf %123, %122 : vector<2x16x16xf32>
    %125 = arith.addf %120, %124 : vector<2x16x16xf32>
    %c17 = arith.constant 17 : index
    %126 = memref.load %arg1[%c17] : memref<49xf32, #tpu.memory_space<smem>>
    %127 = vector.extract_strided_slice %115 {offsets = [0, 2, 0], sizes = [2, 16, 16], strides = [1, 1, 1]} : vector<2x22x16xf32> to vector<2x16x16xf32>
    %128 = vector.broadcast %126 : f32 to vector<2x16x16xf32>
    %129 = arith.mulf %128, %127 : vector<2x16x16xf32>
    %130 = arith.addf %125, %129 : vector<2x16x16xf32>
    %c24 = arith.constant 24 : index
    %131 = memref.load %arg1[%c24] : memref<49xf32, #tpu.memory_space<smem>>
    %132 = vector.extract_strided_slice %115 {offsets = [0, 3, 0], sizes = [2, 16, 16], strides = [1, 1, 1]} : vector<2x22x16xf32> to vector<2x16x16xf32>
    %133 = vector.broadcast %131 : f32 to vector<2x16x16xf32>
    %134 = arith.mulf %133, %132 : vector<2x16x16xf32>
    %135 = arith.addf %130, %134 : vector<2x16x16xf32>
    %c31 = arith.constant 31 : index
    %136 = memref.load %arg1[%c31] : memref<49xf32, #tpu.memory_space<smem>>
    %137 = vector.extract_strided_slice %115 {offsets = [0, 4, 0], sizes = [2, 16, 16], strides = [1, 1, 1]} : vector<2x22x16xf32> to vector<2x16x16xf32>
    %138 = vector.broadcast %136 : f32 to vector<2x16x16xf32>
    %139 = arith.mulf %138, %137 : vector<2x16x16xf32>
    %140 = arith.addf %135, %139 : vector<2x16x16xf32>
    %c38 = arith.constant 38 : index
    %141 = memref.load %arg1[%c38] : memref<49xf32, #tpu.memory_space<smem>>
    %142 = vector.extract_strided_slice %115 {offsets = [0, 5, 0], sizes = [2, 16, 16], strides = [1, 1, 1]} : vector<2x22x16xf32> to vector<2x16x16xf32>
    %143 = vector.broadcast %141 : f32 to vector<2x16x16xf32>
    %144 = arith.mulf %143, %142 : vector<2x16x16xf32>
    %145 = arith.addf %140, %144 : vector<2x16x16xf32>
    %c45 = arith.constant 45 : index
    %146 = memref.load %arg1[%c45] : memref<49xf32, #tpu.memory_space<smem>>
    %147 = vector.extract_strided_slice %115 {offsets = [0, 6, 0], sizes = [2, 16, 16], strides = [1, 1, 1]} : vector<2x22x16xf32> to vector<2x16x16xf32>
    %148 = vector.broadcast %146 : f32 to vector<2x16x16xf32>
    %149 = arith.mulf %148, %147 : vector<2x16x16xf32>
    %150 = arith.addf %145, %149 : vector<2x16x16xf32>
    %c0_30 = arith.constant 0 : index
    %c0_31 = arith.constant 0 : index
    %c4 = arith.constant 4 : index
    %151 = vector.load %arg4[%c0_30, %c0_31, %c4] : memref<2x22x22xf32, #tpu.memory_space<vmem>>, vector<2x22x16xf32>
    %c4_32 = arith.constant 4 : index
    %152 = memref.load %arg1[%c4_32] : memref<49xf32, #tpu.memory_space<smem>>
    %153 = vector.extract_strided_slice %151 {offsets = [0, 0, 0], sizes = [2, 16, 16], strides = [1, 1, 1]} : vector<2x22x16xf32> to vector<2x16x16xf32>
    %154 = vector.broadcast %152 : f32 to vector<2x16x16xf32>
    %155 = arith.mulf %154, %153 : vector<2x16x16xf32>
    %156 = arith.addf %150, %155 : vector<2x16x16xf32>
    %c11 = arith.constant 11 : index
    %157 = memref.load %arg1[%c11] : memref<49xf32, #tpu.memory_space<smem>>
    %158 = vector.extract_strided_slice %151 {offsets = [0, 1, 0], sizes = [2, 16, 16], strides = [1, 1, 1]} : vector<2x22x16xf32> to vector<2x16x16xf32>
    %159 = vector.broadcast %157 : f32 to vector<2x16x16xf32>
    %160 = arith.mulf %159, %158 : vector<2x16x16xf32>
    %161 = arith.addf %156, %160 : vector<2x16x16xf32>
    %c18 = arith.constant 18 : index
    %162 = memref.load %arg1[%c18] : memref<49xf32, #tpu.memory_space<smem>>
    %163 = vector.extract_strided_slice %151 {offsets = [0, 2, 0], sizes = [2, 16, 16], strides = [1, 1, 1]} : vector<2x22x16xf32> to vector<2x16x16xf32>
    %164 = vector.broadcast %162 : f32 to vector<2x16x16xf32>
    %165 = arith.mulf %164, %163 : vector<2x16x16xf32>
    %166 = arith.addf %161, %165 : vector<2x16x16xf32>
    %c25 = arith.constant 25 : index
    %167 = memref.load %arg1[%c25] : memref<49xf32, #tpu.memory_space<smem>>
    %168 = vector.extract_strided_slice %151 {offsets = [0, 3, 0], sizes = [2, 16, 16], strides = [1, 1, 1]} : vector<2x22x16xf32> to vector<2x16x16xf32>
    %169 = vector.broadcast %167 : f32 to vector<2x16x16xf32>
    %170 = arith.mulf %169, %168 : vector<2x16x16xf32>
    %171 = arith.addf %166, %170 : vector<2x16x16xf32>
    %c32 = arith.constant 32 : index
    %172 = memref.load %arg1[%c32] : memref<49xf32, #tpu.memory_space<smem>>
    %173 = vector.extract_strided_slice %151 {offsets = [0, 4, 0], sizes = [2, 16, 16], strides = [1, 1, 1]} : vector<2x22x16xf32> to vector<2x16x16xf32>
    %174 = vector.broadcast %172 : f32 to vector<2x16x16xf32>
    %175 = arith.mulf %174, %173 : vector<2x16x16xf32>
    %176 = arith.addf %171, %175 : vector<2x16x16xf32>
    %c39 = arith.constant 39 : index
    %177 = memref.load %arg1[%c39] : memref<49xf32, #tpu.memory_space<smem>>
    %178 = vector.extract_strided_slice %151 {offsets = [0, 5, 0], sizes = [2, 16, 16], strides = [1, 1, 1]} : vector<2x22x16xf32> to vector<2x16x16xf32>
    %179 = vector.broadcast %177 : f32 to vector<2x16x16xf32>
    %180 = arith.mulf %179, %178 : vector<2x16x16xf32>
    %181 = arith.addf %176, %180 : vector<2x16x16xf32>
    %c46 = arith.constant 46 : index
    %182 = memref.load %arg1[%c46] : memref<49xf32, #tpu.memory_space<smem>>
    %183 = vector.extract_strided_slice %151 {offsets = [0, 6, 0], sizes = [2, 16, 16], strides = [1, 1, 1]} : vector<2x22x16xf32> to vector<2x16x16xf32>
    %184 = vector.broadcast %182 : f32 to vector<2x16x16xf32>
    %185 = arith.mulf %184, %183 : vector<2x16x16xf32>
    %186 = arith.addf %181, %185 : vector<2x16x16xf32>
    %c0_33 = arith.constant 0 : index
    %c0_34 = arith.constant 0 : index
    %c5 = arith.constant 5 : index
    %187 = vector.load %arg4[%c0_33, %c0_34, %c5] : memref<2x22x22xf32, #tpu.memory_space<vmem>>, vector<2x22x16xf32>
    %c5_35 = arith.constant 5 : index
    %188 = memref.load %arg1[%c5_35] : memref<49xf32, #tpu.memory_space<smem>>
    %189 = vector.extract_strided_slice %187 {offsets = [0, 0, 0], sizes = [2, 16, 16], strides = [1, 1, 1]} : vector<2x22x16xf32> to vector<2x16x16xf32>
    %190 = vector.broadcast %188 : f32 to vector<2x16x16xf32>
    %191 = arith.mulf %190, %189 : vector<2x16x16xf32>
    %192 = arith.addf %186, %191 : vector<2x16x16xf32>
    %c12 = arith.constant 12 : index
    %193 = memref.load %arg1[%c12] : memref<49xf32, #tpu.memory_space<smem>>
    %194 = vector.extract_strided_slice %187 {offsets = [0, 1, 0], sizes = [2, 16, 16], strides = [1, 1, 1]} : vector<2x22x16xf32> to vector<2x16x16xf32>
    %195 = vector.broadcast %193 : f32 to vector<2x16x16xf32>
    %196 = arith.mulf %195, %194 : vector<2x16x16xf32>
    %197 = arith.addf %192, %196 : vector<2x16x16xf32>
    %c19_36 = arith.constant 19 : index
    %198 = memref.load %arg1[%c19_36] : memref<49xf32, #tpu.memory_space<smem>>
    %199 = vector.extract_strided_slice %187 {offsets = [0, 2, 0], sizes = [2, 16, 16], strides = [1, 1, 1]} : vector<2x22x16xf32> to vector<2x16x16xf32>
    %200 = vector.broadcast %198 : f32 to vector<2x16x16xf32>
    %201 = arith.mulf %200, %199 : vector<2x16x16xf32>
    %202 = arith.addf %197, %201 : vector<2x16x16xf32>
    %c26 = arith.constant 26 : index
    %203 = memref.load %arg1[%c26] : memref<49xf32, #tpu.memory_space<smem>>
    %204 = vector.extract_strided_slice %187 {offsets = [0, 3, 0], sizes = [2, 16, 16], strides = [1, 1, 1]} : vector<2x22x16xf32> to vector<2x16x16xf32>
    %205 = vector.broadcast %203 : f32 to vector<2x16x16xf32>
    %206 = arith.mulf %205, %204 : vector<2x16x16xf32>
    %207 = arith.addf %202, %206 : vector<2x16x16xf32>
    %c33 = arith.constant 33 : index
    %208 = memref.load %arg1[%c33] : memref<49xf32, #tpu.memory_space<smem>>
    %209 = vector.extract_strided_slice %187 {offsets = [0, 4, 0], sizes = [2, 16, 16], strides = [1, 1, 1]} : vector<2x22x16xf32> to vector<2x16x16xf32>
    %210 = vector.broadcast %208 : f32 to vector<2x16x16xf32>
    %211 = arith.mulf %210, %209 : vector<2x16x16xf32>
    %212 = arith.addf %207, %211 : vector<2x16x16xf32>
    %c40 = arith.constant 40 : index
    %213 = memref.load %arg1[%c40] : memref<49xf32, #tpu.memory_space<smem>>
    %214 = vector.extract_strided_slice %187 {offsets = [0, 5, 0], sizes = [2, 16, 16], strides = [1, 1, 1]} : vector<2x22x16xf32> to vector<2x16x16xf32>
    %215 = vector.broadcast %213 : f32 to vector<2x16x16xf32>
    %216 = arith.mulf %215, %214 : vector<2x16x16xf32>
    %217 = arith.addf %212, %216 : vector<2x16x16xf32>
    %c47 = arith.constant 47 : index
    %218 = memref.load %arg1[%c47] : memref<49xf32, #tpu.memory_space<smem>>
    %219 = vector.extract_strided_slice %187 {offsets = [0, 6, 0], sizes = [2, 16, 16], strides = [1, 1, 1]} : vector<2x22x16xf32> to vector<2x16x16xf32>
    %220 = vector.broadcast %218 : f32 to vector<2x16x16xf32>
    %221 = arith.mulf %220, %219 : vector<2x16x16xf32>
    %222 = arith.addf %217, %221 : vector<2x16x16xf32>
    %c0_37 = arith.constant 0 : index
    %c0_38 = arith.constant 0 : index
    %c6 = arith.constant 6 : index
    %223 = vector.load %arg4[%c0_37, %c0_38, %c6] : memref<2x22x22xf32, #tpu.memory_space<vmem>>, vector<2x22x16xf32>
    %c6_39 = arith.constant 6 : index
    %224 = memref.load %arg1[%c6_39] : memref<49xf32, #tpu.memory_space<smem>>
    %225 = vector.extract_strided_slice %223 {offsets = [0, 0, 0], sizes = [2, 16, 16], strides = [1, 1, 1]} : vector<2x22x16xf32> to vector<2x16x16xf32>
    %226 = vector.broadcast %224 : f32 to vector<2x16x16xf32>
    %227 = arith.mulf %226, %225 : vector<2x16x16xf32>
    %228 = arith.addf %222, %227 : vector<2x16x16xf32>
    %c13 = arith.constant 13 : index
    %229 = memref.load %arg1[%c13] : memref<49xf32, #tpu.memory_space<smem>>
    %230 = vector.extract_strided_slice %223 {offsets = [0, 1, 0], sizes = [2, 16, 16], strides = [1, 1, 1]} : vector<2x22x16xf32> to vector<2x16x16xf32>
    %231 = vector.broadcast %229 : f32 to vector<2x16x16xf32>
    %232 = arith.mulf %231, %230 : vector<2x16x16xf32>
    %233 = arith.addf %228, %232 : vector<2x16x16xf32>
    %c20 = arith.constant 20 : index
    %234 = memref.load %arg1[%c20] : memref<49xf32, #tpu.memory_space<smem>>
    %235 = vector.extract_strided_slice %223 {offsets = [0, 2, 0], sizes = [2, 16, 16], strides = [1, 1, 1]} : vector<2x22x16xf32> to vector<2x16x16xf32>
    %236 = vector.broadcast %234 : f32 to vector<2x16x16xf32>
    %237 = arith.mulf %236, %235 : vector<2x16x16xf32>
    %238 = arith.addf %233, %237 : vector<2x16x16xf32>
    %c27 = arith.constant 27 : index
    %239 = memref.load %arg1[%c27] : memref<49xf32, #tpu.memory_space<smem>>
    %240 = vector.extract_strided_slice %223 {offsets = [0, 3, 0], sizes = [2, 16, 16], strides = [1, 1, 1]} : vector<2x22x16xf32> to vector<2x16x16xf32>
    %241 = vector.broadcast %239 : f32 to vector<2x16x16xf32>
    %242 = arith.mulf %241, %240 : vector<2x16x16xf32>
    %243 = arith.addf %238, %242 : vector<2x16x16xf32>
    %c34 = arith.constant 34 : index
    %244 = memref.load %arg1[%c34] : memref<49xf32, #tpu.memory_space<smem>>
    %245 = vector.extract_strided_slice %223 {offsets = [0, 4, 0], sizes = [2, 16, 16], strides = [1, 1, 1]} : vector<2x22x16xf32> to vector<2x16x16xf32>
    %246 = vector.broadcast %244 : f32 to vector<2x16x16xf32>
    %247 = arith.mulf %246, %245 : vector<2x16x16xf32>
    %248 = arith.addf %243, %247 : vector<2x16x16xf32>
    %c41 = arith.constant 41 : index
    %249 = memref.load %arg1[%c41] : memref<49xf32, #tpu.memory_space<smem>>
    %250 = vector.extract_strided_slice %223 {offsets = [0, 5, 0], sizes = [2, 16, 16], strides = [1, 1, 1]} : vector<2x22x16xf32> to vector<2x16x16xf32>
    %251 = vector.broadcast %249 : f32 to vector<2x16x16xf32>
    %252 = arith.mulf %251, %250 : vector<2x16x16xf32>
    %253 = arith.addf %248, %252 : vector<2x16x16xf32>
    %c48 = arith.constant 48 : index
    %254 = memref.load %arg1[%c48] : memref<49xf32, #tpu.memory_space<smem>>
    %255 = vector.extract_strided_slice %223 {offsets = [0, 6, 0], sizes = [2, 16, 16], strides = [1, 1, 1]} : vector<2x22x16xf32> to vector<2x16x16xf32>
    %256 = vector.broadcast %254 : f32 to vector<2x16x16xf32>
    %257 = arith.mulf %256, %255 : vector<2x16x16xf32>
    %258 = arith.addf %253, %257 : vector<2x16x16xf32>
    %259 = arith.negf %258 : vector<2x16x16xf32>
    %260 = math.exp %259 : vector<2x16x16xf32>
    %cst_40 = arith.constant 1.000000e+00 : f32
    %261 = vector.broadcast %cst_40 : f32 to vector<2x16x16xf32>
    %262 = arith.addf %261, %260 : vector<2x16x16xf32>
    %263 = arith.divf %261, %262 : vector<2x16x16xf32>
    %c0_41 = arith.constant 0 : index
    %c0_42 = arith.constant 0 : index
    %c0_43 = arith.constant 0 : index
    %264 = vector.load %arg2[%c0_41, %c0_42, %c0_43] : memref<2x16x16xf32, #tpu.memory_space<vmem>>, vector<2x16x16xf32>
    %265 = arith.mulf %264, %263 : vector<2x16x16xf32>
    %c0_44 = arith.constant 0 : index
    %c0_45 = arith.constant 0 : index
    %c0_46 = arith.constant 0 : index
    %266 = vector.load %arg3[%c0_44, %c0_45, %c0_46] : memref<2x16x16xf32, #tpu.memory_space<vmem>>, vector<2x16x16xf32>
    tpu.vector_store %arg3[%c0_44, %c0_45, %c0_46], %265 {strides = array<i32>} : memref<2x16x16xf32, #tpu.memory_space<vmem>>, vector<2x16x16xf32>,
    return
  }
  func.func @transform_0(%arg0: i32) -> i32 {
    %c0_i32 = arith.constant 0 : i32
    %c0_i32_0 = arith.constant 0 : i32
    return %c0_i32 : i32
  }
  func.func @transform_1(%arg0: i32) -> (i32, i32, i32) {
    %c0_i32 = arith.constant 0 : i32
    %c0_i32_0 = arith.constant 0 : i32
    %c0_i32_1 = arith.constant 0 : i32
    return %arg0, %c0_i32, %c0_i32_0 : i32, i32, i32
  }
  func.func @transform_2(%arg0: i32) -> (i32, i32, i32) {
    %c0_i32 = arith.constant 0 : i32
    %c0_i32_0 = arith.constant 0 : i32
    %c0_i32_1 = arith.constant 0 : i32
    return %arg0, %c0_i32, %c0_i32_0 : i32, i32, i32
  }
}

</mosaic_0001>

<bundles_post_ra>
// kernel: spatial_attention.1
= control target key start
LH: loop header
LB: loop body
LE: loop exit
PB: predicated region body
PF: predicated region fallthrough
CT: control target
= control target key end

     0   :  { %7 = vsyncpa [#allocation6], 0  ;;  %s3156_s0 = inlined_call_operand.vmem [shape: f32[49], index: 0, kind: input, shape index: {}]   ;;  %s3157_s1 = inlined_call_operand.hbm [shape: f32[2,16,16], index: 1, kind: input, shape index: {}]   ;;  %s3158_s2 = inlined_call_operand.hbm [shape: f32[2,16,16], index: 2, kind: output, shape index: {}]  }
   0x1   :  { %8 = vsyncpa [#allocation4], 0 }
   0x2   :  { %9 = vsyncpa [#allocation5], 0  ;;  %s15_s11 = sshll.u32 %s3156_s0, 4  ;;  %s23_s14 = sshll.u32 %s3157_s1, 4  ;;  %s16_s11 = int_to_ptr.vmem [resolvable:$true] %s15_s11  ;;  %s24_s14 = int_to_ptr.hbm [resolvable:$true] %s23_s14 }
   0x3   :  { %s2161_s15 = smov [#allocation3]   ;;  %s2162_s16 = smov [#allocation7]  }
   0x4   :  { %18 = dma.vmem_to_smem %s16_s11, 16, %s2161_s15, [#allocation6]  }
   0x5   :  { %s25_s17 = sshll.u32 %s2162_s16, 4  ;;  %s2163_s18 = smov 128   ;;  %s26_s17 = int_to_ptr.vmem [resolvable:$true] %s25_s17 }
   0x6   :  { %s2164_s19 = smov 8  }
   0x7   :  { %31 = dma.hbm_to_vmem [thread:$0]  %s24_s14, 512, %s26_s17, [#allocation4], %s2163_s18, %s2163_s18, %s2164_s19  }
   0x8   :  { %2155 = dma.done.wait [#allocation6], 16  }
   0x9   :  { %2156 = vsyncadd [#allocation6], 4294967280 }
   0xa   :  { %2157 = dma.done.wait [#allocation4], 512  }
   0xb   :  { %2158 = vsyncadd [#allocation4], 4294966784 }
   0xc   :  { %40 = sfence }
   0xd   :  { %v64_v0 = vld [vmem:[#allocation7 + $0x10] sm:$0xff]  ;;  %v62_v1 = vld [vmem:[#allocation7] sm:$0xff]  ;;  %s2165_s0 = smov 3   ;;  %v65_v2 = vld [vmem:[#allocation7 + $0x18] sm:$0xff]  ;;  %vm41_vm0 = vcmask 174080   ;;  %v2166_v4 = vmov 0.0  }
   0xe   :  { %74 = vrot.lane.b32.xlu1 %v64_v0, %s2165_s0  ;;  %70 = vrot.lane.b32.xlu0 %v62_v1, %s2165_s0  ;;  %v63_v3 = vld [vmem:[#allocation7 + $0x8] sm:$0xff]  ;;  %43 = vst.msk [vmem:[#allocation2 + $0x18] sm:$0x7] %vm41_vm0, %v2166_v4  ;;  %vm46_vm1 = vcmask 23552   ;;  %vm54_vm2 = vcmask 179352   ;;  %vm49_vm3 = vcmask 21504  }
   0xf   :  { %51 = vst.msk [vmem:[#allocation2 + $0x18] sm:$0xff] %vm46_vm1, %v2166_v4  ;;  %vm57_vm4 = vcmask 177304   ;;  %vm82_vm5 = vcmask 154648   ;;  %s2008_s1 = sld [smem:[#allocation3 + $0x1]]  ;;  %s2167_s22 = smov 127   ;;  %vm113_vm6 = vcmask 1046528  }
  0x10   :  { %52 = vst.msk [vmem:[#allocation2 + $0x20] sm:$0xff] %vm46_vm1, %v2166_v4  ;;  %s2015_s20 = sld [smem:[#allocation3 + $0x2]]  ;;  %s2168_s24 = smov 126   ;;  %vm146_vm7 = vcmask 1045504   ;;  %vm179_vm8 = vcmask 1044480   ;;  %vm212_vm9 = vcmask 1043456  }
  0x11   :  { %59 = vst.msk [vmem:[#allocation2 + $0x18] sm:$0xff] %vm54_vm2, %v2166_v4  ;;  %s2009_s21 = sld [smem:[#allocation3 + $0x8]]  ;;  %vm245_vm10 = vcmask 1042432   ;;  %vm278_vm11 = vcmask 1041408   ;;  %s2169_s16 = smov 125  }
  0x12   :  { %60 = vst.msk [vmem:[#allocation2 + $0x20] sm:$0xff] %vm54_vm2, %v2166_v4  ;;  %s2010_s23 = sld [smem:[#allocation3 + $0xf]] }
  0x13   :  { %42 = vst.msk [vmem:[#allocation2] sm:$0x7] %vm41_vm0, %v2166_v4  ;;  %s2011_s25 = sld [smem:[#allocation3 + $0x16]] }
  0x14   :  { %44 = vst.msk [vmem:[#allocation2 + $0x13] sm:$0x7] %vm41_vm0, %v2166_v4  ;;  %s2012_s26 = sld [smem:[#allocation3 + $0x1d]] }
  0x15   :  { %45 = vst.msk [vmem:[#allocation2 + $0x2b] sm:$0x7] %vm41_vm0, %v2166_v4  ;;  %v298_v7 = vstv %s2008_s1  ;;  %s2013_s27 = sld [smem:[#allocation3 + $0x24]]  ;;  %vm1977_vm0 = vcmask 130048  }
  0x16   :  { %76 = vrot.lane.b32.xlu1 %v65_v2, %s2165_s0  ;;  %72 = vrot.lane.b32.xlu0 %v63_v3, %s2165_s0  ;;  %48 = vst.msk [vmem:[#allocation2 + $0x8] sm:$0xff] %vm46_vm1, %v2166_v4  ;;  %v564_v18 = vstv %s2015_s20  ;;  %s2014_s28 = sld [smem:[#allocation3 + $0x2b]] }
  0x17   :  { %47 = vst.msk [vmem:[#allocation2] sm:$0xff] %vm46_vm1, %v2166_v4  ;;  %v324_v21 = vstv %s2009_s21  ;;  %s2016_s29 = sld [smem:[#allocation3 + $0x9]] }
  0x18   :  { %55 = vst.msk [vmem:[#allocation2] sm:$0xff] %vm54_vm2, %v2166_v4  ;;  %v364_v29 = vstv %s2010_s23  ;;  %s2017_s30 = sld [smem:[#allocation3 + $0x10]] }
  0x19   :  { %56 = vst.msk [vmem:[#allocation2 + $0x8] sm:$0xff] %vm54_vm2, %v2166_v4  ;;  %v404_v50 = vstv %s2011_s25  ;;  %s2018_s3 = sld [smem:[#allocation3 + $0x17]]  ;;  %s2170_s25 = smov 124  }
  0x1a   :  { %53 = vst.msk [vmem:[#allocation2 + $0x28] sm:$0x3f] %vm49_vm3, %v2166_v4  ;;  %v444_v2 = vstv %s2012_s26  ;;  %s2019_s4 = sld [smem:[#allocation3 + $0x1e]] }
  0x1b   :  { %61 = vst.msk [vmem:[#allocation2 + $0x28] sm:$0x3f] %vm57_vm4, %v2166_v4  ;;  %s2002_s5 = sld [smem:[#allocation3 + $0x7]] }
  0x1c   :  { %50 = vst.msk [vmem:[#allocation2 + $0x10] sm:$0x3f] %vm49_vm3, %v2166_v4  ;;  %s2003_s6 = sld [smem:[#allocation3 + $0xe]] }
  0x1d   :  { %58 = vst.msk [vmem:[#allocation2 + $0x10] sm:$0x3f] %vm57_vm4, %v2166_v4  ;;  %s93_s7 = sld [smem:[#allocation3]] }
  0x1e   :  { %s2004_s8 = sld [smem:[#allocation3 + $0x15]] }
  0x1f   :  { %s2363_s9 = sld [smem:[#allocation3 + $0x1c]] }
  0x20   :  { %s2370_s10 = sld [smem:[#allocation3 + $0x23]] }
  0x21   :  { %s2374_s11 = sld [smem:[#allocation3 + $0x2a]] }
  0x22   :  { %s2383_s12 = sld [smem:[#allocation3 + $0x25]] }
  0x23   :  { %s2439_s13 = sld [smem:[#allocation3 + $0x2c]] }
  0x24   :  { %s2531_s14 = sld [smem:[#allocation3 + $0x3]] }
  0x25   :  { %s2608_s15 = sld [smem:[#allocation3 + $0xa]] }
  0x26   :  { %s2659_s17 = sld [smem:[#allocation3 + $0x11]] }
  0x27   :  { %s2712_s0 = sld [smem:[#allocation3 + $0x18]] }
  0x28   :  { %s2026_s1 = sld [smem:[#allocation3 + $0x1f]] }
  0x29   :  { %s2027_s20 = sld [smem:[#allocation3 + $0x26]] }
  0x2a   :  { %s2028_s21 = sld [smem:[#allocation3 + $0x2d]] }
  0x2b   :  { %s2030_s23 = sld [smem:[#allocation3 + $0xb]] }
  0x2c   :  { %s2032_s26 = sld [smem:[#allocation3 + $0x19]] }
  0x80   :  { %v75_v5 = vpop.permute.xlu1 %74  ;;  %v71_v6 = vpop.permute.xlu0 %70 }
  0x81   :  { %85 = vst.msk [vmem:[#allocation2 + $0x1b] sm:$0xff] %vm82_vm5, %v75_v5 }
  0x82   :  { %83 = vst.msk [vmem:[#allocation2 + $0x3] sm:$0xff] %vm82_vm5, %v71_v6 }
  0x88   :  { %v2198_v8 = vld [vmem:[#allocation2 + $0x18] sm:$0xff]  ;;  %v77_v9 = vpop.permute.xlu1 %76  ;;  %v73_v10 = vpop.permute.xlu0 %72 }
  0x89   :  { %v2200_v11 = vld [vmem:[#allocation2] sm:$0xff]  ;;  %86 = vst.msk [vmem:[#allocation2 + $0x23] sm:$0xff] %vm82_vm5, %v77_v9  ;;  %v301_v12 = vmul.f32 %v298_v7, %v2198_v8  ;;  %v567_v26 = vmul.f32 %v564_v18, %v2198_v8  ;;  %v328_v32 = vmul.f32 %v324_v21, %v2198_v8  ;;  %v408_v58 = vmul.f32 %v404_v50, %v2198_v8 }
  0x8a   :  { %84 = vst.msk [vmem:[#allocation2 + $0xb] sm:$0xff] %vm82_vm5, %v73_v10  ;;  %v299_v13 = vmul.f32 %v298_v7, %v2200_v11  ;;  %v565_v27 = vmul.f32 %v564_v18, %v2200_v11  ;;  %v365_v33 = vmul.f32 %v364_v29, %v2200_v11  ;;  %v325_v45 = vmul.f32 %v324_v21, %v2200_v11 }
  0x8b   :  { %311 = vrot.lane.b32.xlu0 %v301_v12, %s2167_s22  ;;  %v342_v37 = vrot.slane %v328_v32, 1  ;;  %v405_v57 = vmul.f32 %v404_v50, %v2200_v11  ;;  %v422_v63 = vrot.slane %v408_v58, 3 }
  0x8c   :  { %307 = vrot.lane.b32.xlu2 %v299_v13, %s2167_s22  ;;  %v377_v38 = vrot.slane %v365_v33, 2  ;;  %v337_v49 = vrot.slane %v325_v45, 1 }
  0x8d   :  { %v417_v62 = vrot.slane %v405_v57, 3 }
  0x90   :  { %v2206_v14 = vld [vmem:[#allocation2 + $0x20] sm:$0xff]  ;;  %v2230_v36 = vld [vmem:[#allocation2 + $0x28] sm:$0x3f] }
  0x91   :  { %v2208_v15 = vld [vmem:[#allocation2 + $0x8] sm:$0xff]  ;;  %v2210_v16 = vld [vmem:[#allocation2 + $0x10] sm:$0x3f]  ;;  %v302_v17 = vmul.f32 %v298_v7, %v2206_v14  ;;  %v329_v28 = vmul.f32 %v324_v21, %v2206_v14  ;;  %v568_v40 = vmul.f32 %v564_v18, %v2206_v14  ;;  %v369_v43 = vmul.f32 %v364_v29, %v2206_v14 }
  0x92   :  { %v566_v19 = vmul.f32 %v564_v18, %v2208_v15  ;;  %v300_v20 = vmul.f32 %v298_v7, %v2208_v15  ;;  %v326_v22 = vmul.f32 %v324_v21, %v2208_v15  ;;  %v327_v23 = vmul.f32 %v324_v21, %v2210_v16 }
  0x93   :  { %313 = vrot.lane.b32.xlu1 %v302_v17, %s2167_s22  ;;  %v366_v31 = vmul.f32 %v364_v29, %v2208_v15  ;;  %v343_v34 = vrot.slane %v329_v28, 1  ;;  %v367_v41 = vmul.f32 %v364_v29, %v2210_v16  ;;  %v370_v44 = vmul.f32 %v364_v29, %v2230_v36 }
  0x94   :  { %575 = vrot.lane.b32.xlu0 %v566_v19, %s2168_s24  ;;  %309 = vrot.lane.b32.xlu2 %v300_v20, %s2167_s22  ;;  %v338_v24 = vrot.slane %v326_v22, 1  ;;  %v340_v25 = vrot.slane %v327_v23, 1  ;;  %v383_v47 = vrot.slane %v369_v43, 2  ;;  %v406_v52 = vmul.f32 %v404_v50, %v2208_v15 }
  0x95   :  { %v378_v35 = vrot.slane %v366_v31, 2  ;;  %v344_v39 = vsel %vm113_vm6, %v342_v37, %v343_v34  ;;  %v380_v46 = vrot.slane %v367_v41, 2  ;;  %v385_v48 = vrot.slane %v370_v44, 2 }
  0x96   :  { %v341_v30 = vsel %vm113_vm6, %v338_v24, %v340_v25  ;;  %v339_v54 = vsel %vm113_vm6, %v337_v49, %v338_v24  ;;  %v409_v55 = vmul.f32 %v404_v50, %v2206_v14  ;;  %v330_v56 = vmul.f32 %v324_v21, %v2230_v36 }
  0x97   :  { %v379_v42 = vsel %vm146_vm7, %v377_v38, %v378_v35  ;;  %v381_v51 = vsel %vm146_vm7, %v378_v35, %v380_v46  ;;  %v386_v53 = vsel %vm146_vm7, %v383_v47, %v385_v48  ;;  %v418_v59 = vrot.slane %v406_v52, 3 }
  0x98   :  { %v423_v60 = vrot.slane %v409_v55, 3  ;;  %v345_v61 = vrot.slane %v330_v56, 1  ;;  %v410_v1 = vmul.f32 %v404_v50, %v2230_v36  ;;  %v446_v5 = vmul.f32 %v444_v2, %v2208_v15 }
  0x99   :  { %v419_v0 = vsel %vm179_vm8, %v417_v62, %v418_v59  ;;  %v447_v6 = vmul.f32 %v444_v2, %v2210_v16  ;;  %v368_v7 = vmul.f32 %v364_v29, %v2198_v8  ;;  %v449_v18 = vmul.f32 %v444_v2, %v2206_v14 }
  0x9a   :  { %v424_v3 = vsel %vm179_vm8, %v422_v63, %v423_v60  ;;  %v346_v4 = vsel %vm113_vm6, %v343_v34, %v345_v61  ;;  %v425_v9 = vrot.slane %v410_v1, 3  ;;  %v458_v10 = vrot.slane %v446_v5, 4 }
  0x9b   :  { %577 = vrot.lane.b32.xlu1 %v567_v26, %s2168_s24  ;;  %v460_v12 = vrot.slane %v447_v6, 4  ;;  %v382_v13 = vrot.slane %v368_v7, 2  ;;  %v484_v19 = vstv %s2013_s27  ;;  %v407_v23 = vmul.f32 %v404_v50, %v2210_v16  ;;  %s2033_s27 = sld [smem:[#allocation3 + $0x20]] }
  0x9c   :  { %349 = vrot.lane.b32.xlu0 %v341_v30, %s2167_s22  ;;  %573 = vrot.lane.b32.xlu2 %v565_v27, %s2168_s24  ;;  %v426_v17 = vsel %vm179_vm8, %v423_v60, %v425_v9  ;;  %v486_v22 = vmul.f32 %v484_v19, %v2208_v15  ;;  %v448_v24 = vmul.f32 %v444_v2, %v2198_v8  ;;  %v463_v26 = vrot.slane %v449_v18, 4 }
  0x9d   :  { %v461_v20 = vsel %vm212_vm9, %v458_v10, %v460_v12  ;;  %v384_v21 = vsel %vm146_vm7, %v382_v13, %v383_v47  ;;  %v485_v25 = vmul.f32 %v484_v19, %v2200_v11  ;;  %v420_v28 = vrot.slane %v407_v23, 3 }
  0x9e   :  { %v498_v27 = vrot.slane %v486_v22, 5  ;;  %v462_v29 = vrot.slane %v448_v24, 4  ;;  %v487_v32 = vmul.f32 %v484_v19, %v2210_v16  ;;  %v489_v35 = vmul.f32 %v484_v19, %v2206_v14 }
  0x9f   :  { %v497_v30 = vrot.slane %v485_v25, 5  ;;  %v421_v34 = vsel %vm179_vm8, %v418_v59, %v420_v28  ;;  %v490_v37 = vmul.f32 %v484_v19, %v2230_v36  ;;  %v445_v38 = vmul.f32 %v444_v2, %v2200_v11 }
  0xa0   :  { %v464_v31 = vsel %vm212_vm9, %v462_v29, %v463_v26  ;;  %v524_v43 = vstv %s2014_s28  ;;  %v450_v49 = vmul.f32 %v444_v2, %v2230_v36  ;;  %v590_v59 = vstv %s2016_s29  ;;  %s2034_s28 = sld [smem:[#allocation3 + $0x27]] }
  0xa1   :  { %v499_v33 = vsel %vm245_vm10, %v497_v30, %v498_v27  ;;  %v505_v41 = vrot.slane %v490_v37, 5  ;;  %v526_v45 = vmul.f32 %v524_v43, %v2208_v15  ;;  %v529_v48 = vmul.f32 %v524_v43, %v2206_v14  ;;  %s2035_s29 = sld [smem:[#allocation3 + $0x2e]] }
  0xa2   :  { %v525_v50 = vmul.f32 %v524_v43, %v2200_v11  ;;  %v530_v58 = vmul.f32 %v524_v43, %v2230_v36  ;;  %v592_v62 = vmul.f32 %v590_v59, %v2208_v15  ;;  %v488_v63 = vmul.f32 %v484_v19, %v2198_v8 }
  0xa3   :  { %351 = vrot.lane.b32.xlu1 %v344_v39, %s2167_s22  ;;  %v500_v39 = vrot.slane %v487_v32, 5  ;;  %v538_v52 = vrot.slane %v526_v45, 6  ;;  %v593_v7 = vmul.f32 %v590_v59, %v2210_v16  ;;  %v596_v12 = vmul.f32 %v590_v59, %v2230_v36 }
  0xa4   :  { %387 = vrot.lane.b32.xlu0 %v379_v42, %s2167_s22  ;;  %579 = vrot.lane.b32.xlu2 %v568_v40, %s2168_s24  ;;  %v503_v40 = vrot.slane %v489_v35, 5  ;;  %v457_v42 = vrot.slane %v445_v38, 4  ;;  %v537_v55 = vrot.slane %v525_v50, 6  ;;  %v545_v1 = vrot.slane %v530_v58, 6 }
  0xa5   :  { %v501_v44 = vsel %vm245_vm10, %v498_v27, %v500_v39  ;;  %v604_v2 = vrot.slane %v592_v62, 1  ;;  %v527_v13 = vmul.f32 %v524_v43, %v2210_v16  ;;  %v611_v19 = vrot.slane %v596_v12, 1 }
  0xa6   :  { %v506_v46 = vsel %vm245_vm10, %v503_v40, %v505_v41  ;;  %v459_v47 = vsel %vm212_vm9, %v457_v42, %v458_v10  ;;  %v539_v57 = vsel %vm278_vm11, %v537_v55, %v538_v52  ;;  %v595_v10 = vmul.f32 %v590_v59, %v2206_v14 }
  0xa7   :  { %v594_v29 = vmul.f32 %v590_v59, %v2198_v8 }
  0xa8   :  { %v609_v18 = vrot.slane %v595_v10, 1 }
  0xa9   :  { %v608_v35 = vrot.slane %v594_v29, 1 }
  0xaa   :  { %v612_v25 = vsel %vm113_vm6, %v609_v18, %v611_v19 }
  0xab   :  { %389 = vrot.lane.b32.xlu1 %v381_v51, %s2167_s22  ;;  %v528_v51 = vmul.f32 %v524_v43, %v2198_v8  ;;  %v610_v41 = vsel %vm113_vm6, %v608_v35, %v609_v18 }
  0xac   :  { %393 = vrot.lane.b32.xlu0 %v386_v53, %s2167_s22  ;;  %347 = vrot.lane.b32.xlu2 %v339_v54, %s2167_s22  ;;  %v543_v53 = vrot.slane %v529_v48, 6  ;;  %v465_v54 = vrot.slane %v450_v49, 4 }
  0xad   :  { %v542_v56 = vrot.slane %v528_v51, 6 }
  0xae   :  { %v466_v61 = vsel %vm212_vm9, %v463_v26, %v465_v54  ;;  %v546_v5 = vsel %vm278_vm11, %v543_v53, %v545_v1  ;;  %v2372_v1 = vstv %s2003_s6  ;;  %s2039_s6 = sld [smem:[#allocation3 + $0x1a]] }
  0xaf   :  { %v544_v60 = vsel %vm278_vm11, %v542_v56, %v543_v53  ;;  %v2346_v53 = vstv %s2002_s5  ;;  %s2038_s5 = sld [smem:[#allocation3 + $0x13]] }
  0xb3   :  { %427 = vrot.lane.b32.xlu1 %v419_v0, %s2167_s22  ;;  %v591_v0 = vmul.f32 %v590_v59, %v2200_v11  ;;  %v2359_v59 = vmul.f32 %v2346_v53, %v2208_v15 }
  0xb4   :  { %431 = vrot.lane.b32.xlu0 %v424_v3, %s2167_s22  ;;  %353 = vrot.lane.b32.xlu2 %v346_v4, %s2167_s22  ;;  %v502_v3 = vrot.slane %v488_v63, 5 }
  0xb5   :  { %v603_v4 = vrot.slane %v591_v0, 1 }
  0xb6   :  { %v504_v6 = vsel %vm245_vm10, %v502_v3, %v503_v40  ;;  %v670_v40 = vstv %s2018_s3  ;;  %s2037_s3 = sld [smem:[#allocation3 + $0xc]] }
  0xb7   :  { %v605_v9 = vsel %vm113_vm6, %v603_v4, %v604_v2  ;;  %v672_v42 = vmul.f32 %v670_v40, %v2208_v15  ;;  %v673_v43 = vmul.f32 %v670_v40, %v2210_v16  ;;  %v2342_v51 = vmul.f32 %v670_v40, %v2206_v14 }
  0xb8   :  { %v671_v58 = vmul.f32 %v670_v40, %v2200_v11  ;;  %v2376_v4 = vstv %s93_s7  ;;  %s2040_s7 = sld [smem:[#allocation3 + $0x21]] }
  0xb9   :  { %v686_v48 = vrot.slane %v673_v43, 3  ;;  %v689_v63 = vrot.slane %v2342_v51, 3  ;;  %v750_v43 = vstv %s2383_s12  ;;  %s2172_s12 = smov 122  }
  0xba   :  { %v683_v3 = vrot.slane %v671_v58, 3 }
  0xbb   :  { %433 = vrot.lane.b32.xlu1 %v426_v17, %s2167_s22  ;;  %v606_v17 = vrot.slane %v593_v7, 1 }
  0xbc   :  { %469 = vrot.lane.b32.xlu0 %v461_v20, %s2167_s22  ;;  %391 = vrot.lane.b32.xlu2 %v384_v21, %s2167_s22  ;;  %v540_v20 = vrot.slane %v527_v13, 6  ;;  %v630_v21 = vstv %s2017_s30  ;;  %s2036_s30 = sld [smem:[#allocation3 + $0x5]] }
  0xbd   :  { %v607_v22 = vsel %vm113_vm6, %v604_v2, %v606_v17  ;;  %v632_v23 = vmul.f32 %v630_v21, %v2208_v15  ;;  %v635_v24 = vmul.f32 %v630_v21, %v2206_v14  ;;  %v631_v27 = vmul.f32 %v630_v21, %v2200_v11 }
  0xbe   :  { %v541_v26 = vsel %vm278_vm11, %v538_v52, %v540_v20  ;;  %v634_v28 = vmul.f32 %v630_v21, %v2198_v8  ;;  %v636_v39 = vmul.f32 %v630_v21, %v2230_v36  ;;  %v2344_v52 = vstv %s2019_s4  ;;  %s2171_s4 = smov 123  }
  0xbf   :  { %v649_v32 = vrot.slane %v635_v24, 2  ;;  %v712_v56 = vmul.f32 %v2344_v52, %v2208_v15  ;;  %v713_v13 = vmul.f32 %v2344_v52, %v2210_v16  ;;  %v2393_v18 = vmul.f32 %v2344_v52, %v2206_v14 }
  0xc0   :  { %v716_v19 = vmul.f32 %v2344_v52, %v2230_v36  ;;  %v676_v20 = vmul.f32 %v670_v40, %v2230_v36 }
  0xc1   :  { %v724_v0 = vrot.slane %v712_v56, 4  ;;  %v726_v29 = vrot.slane %v713_v13, 4 }
  0xc3   :  { %471 = vrot.lane.b32.xlu1 %v464_v31, %s2167_s22  ;;  %v644_v31 = vrot.slane %v632_v23, 2  ;;  %v134_v23 = vmul.f32 %v2372_v1, %v2200_v11 }
  0xc4   :  { %507 = vrot.lane.b32.xlu0 %v499_v33, %s2167_s22  ;;  %429 = vrot.lane.b32.xlu2 %v421_v34, %s2167_s22  ;;  %v643_v33 = vrot.slane %v631_v27, 2  ;;  %v648_v34 = vrot.slane %v634_v28, 2  ;;  %v95_v27 = vmul.f32 %v2376_v4, %v2200_v11 }
  0xc6   :  { %v645_v37 = vsel %vm146_vm7, %v643_v33, %v644_v31  ;;  %v650_v38 = vsel %vm146_vm7, %v648_v34, %v649_v32  ;;  %v731_v33 = vrot.slane %v716_v19, 4  ;;  %v691_v34 = vrot.slane %v676_v20, 3 }
  0xc8   :  { %v692_v51 = vsel %vm179_vm8, %v689_v63, %v691_v34 }
  0xcb   :  { %509 = vrot.lane.b32.xlu1 %v501_v44, %s2167_s22  ;;  %v633_v44 = vmul.f32 %v630_v21, %v2210_v16  ;;  %v2400_v21 = vstv %s2004_s8  ;;  %s2041_s8 = sld [smem:[#allocation3 + $0x28]] }
  0xcc   :  { %513 = vrot.lane.b32.xlu0 %v506_v46, %s2167_s22  ;;  %467 = vrot.lane.b32.xlu2 %v459_v47, %s2167_s22  ;;  %v651_v46 = vrot.slane %v636_v39, 2  ;;  %v684_v47 = vrot.slane %v672_v42, 3  ;;  %v167_v42 = vmul.f32 %v2400_v21, %v2200_v11 }
  0xcd   :  { %v646_v49 = vrot.slane %v633_v44, 2 }
  0xce   :  { %v652_v50 = vsel %vm146_vm7, %v649_v32, %v651_v46  ;;  %v687_v54 = vsel %vm179_vm8, %v684_v47, %v686_v48  ;;  %v685_v12 = vsel %vm179_vm8, %v683_v3, %v684_v47  ;;  %v729_v32 = vrot.slane %v2393_v18, 4 }
  0xcf   :  { %v647_v55 = vsel %vm146_vm7, %v644_v31, %v646_v49  ;;  %v727_v47 = vsel %vm212_vm9, %v724_v0, %v726_v29  ;;  %v2448_v48 = vmul.f32 %v750_v43, %v2208_v15  ;;  %v180_v58 = vrot.slane %v167_v42, 3 }
  0xd0   :  { %v2488_v29 = vstv %s2439_s13  ;;  %s2045_s13 = sld [smem:[#allocation3 + $0x14]] }
  0xd3   :  { %547 = vrot.lane.b32.xlu1 %v539_v57, %s2167_s22  ;;  %v674_v57 = vmul.f32 %v670_v40, %v2198_v8 }
  0xd4   :  { %551 = vrot.lane.b32.xlu0 %v544_v60, %s2167_s22  ;;  %473 = vrot.lane.b32.xlu2 %v466_v61, %s2167_s22  ;;  %v711_v60 = vmul.f32 %v2344_v52, %v2200_v11  ;;  %v101_v61 = vmul.f32 %v2346_v53, %v2200_v11 }
  0xd5   :  { %v688_v2 = vrot.slane %v674_v57, 3  ;;  %v751_v57 = vmul.f32 %v750_v43, %v2200_v11 }
  0xd6   :  { %v723_v7 = vrot.slane %v711_v60, 4 }
  0xd7   :  { %v690_v10 = vsel %vm179_vm8, %v688_v2, %v689_v63  ;;  %v714_v63 = vmul.f32 %v2344_v52, %v2198_v8  ;;  %v763_v20 = vrot.slane %v751_v57, 5 }
  0xd8   :  { %v725_v17 = vsel %vm212_vm9, %v723_v7, %v724_v0 }
  0xdb   :  { %553 = vrot.lane.b32.xlu1 %v546_v5, %s2167_s22  ;;  %v115_v5 = vrot.slane %v2359_v59, 1 }
  0xdc   :  { %613 = vrot.lane.b32.xlu0 %v605_v9, %s2168_s24  ;;  %511 = vrot.lane.b32.xlu2 %v504_v6, %s2167_s22  ;;  %v2381_v6 = vmul.f32 %v2372_v1, %v2208_v15  ;;  %v114_v9 = vrot.slane %v101_v61, 1  ;;  %v754_v61 = vmul.f32 %v750_v43, %v2198_v8 }
  0xde   :  { %v148_v31 = vrot.slane %v2381_v6, 2 }
  0xe3   :  { %615 = vrot.lane.b32.xlu1 %v607_v22, %s2168_s24  ;;  %v116_v22 = vsel %vm113_vm6, %v114_v9, %v115_v5  ;;  %v764_v9 = vrot.slane %v2448_v48, 5  ;;  %v793_v48 = vmul.f32 %v2488_v29, %v2210_v16 }
  0xe4   :  { %619 = vrot.lane.b32.xlu0 %v612_v25, %s2168_s24  ;;  %549 = vrot.lane.b32.xlu2 %v541_v26, %s2167_s22  ;;  %v2411_v25 = vmul.f32 %v2400_v21, %v2208_v15  ;;  %v2414_v26 = vstv %s2363_s9  ;;  %v128_v39 = vadd.f32 %v116_v22, %v95_v27  ;;  %v103_v22 = vmul.f32 %v2346_v53, %v2210_v16  ;;  %s2029_s22 = sld [smem:[#allocation3 + $0x4]] }
  0xe5   :  { %v2424_v35 = vmul.f32 %v2414_v26, %v2208_v15  ;;  %v200_v56 = vmul.f32 %v2414_v26, %v2200_v11  ;;  %v728_v27 = vrot.slane %v714_v63, 4  ;;  %v765_v34 = vsel %vm245_vm10, %v763_v20, %v764_v9  ;;  %s2042_s9 = sld [smem:[#allocation3 + $0x2f]] }
  0xe6   :  { %v2326_v30 = vpop.permute.xlu2 %307  ;;  %v181_v44 = vrot.slane %v2411_v25, 3 }
  0xe7   :  { %v214_v0 = vrot.slane %v2424_v35, 4  ;;  %v213_v18 = vrot.slane %v200_v56, 4 }
  0xeb   :  { %653 = vrot.lane.b32.xlu1 %v645_v37, %s2168_s24  ;;  %v2427_v37 = vstv %s2370_s10  ;;  %s2043_s10 = sld [smem:[#allocation3 + $0x6]] }
  0xec   :  { %657 = vrot.lane.b32.xlu0 %v650_v38, %s2168_s24  ;;  %617 = vrot.lane.b32.xlu2 %v610_v41, %s2168_s24  ;;  %v2430_v38 = vstv %s2374_s11  ;;  %v2434_v40 = vmul.f32 %v2427_v37, %v2208_v15  ;;  %v147_v41 = vrot.slane %v134_v23, 2  ;;  %v233_v52 = vmul.f32 %v2427_v37, %v2200_v11  ;;  %s2044_s11 = sld [smem:[#allocation3 + $0xd]] }
  0xed   :  { %v2444_v46 = vmul.f32 %v2430_v38, %v2208_v15  ;;  %v266_v19 = vmul.f32 %v2430_v38, %v2200_v11  ;;  %v768_v23 = vrot.slane %v754_v61, 5  ;;  %v117_v61 = vrot.slane %v103_v22, 1 }
  0xee   :  { %v2338_v45 = vpop.permute.xlu2 %309  ;;  %v149_v49 = vsel %vm146_vm7, %v147_v41, %v148_v31  ;;  %v3160_v2 = vrot.slane %v2434_v40, 5  ;;  %v2498_v41 = vmul.f32 %v2488_v29, %v2208_v15  ;;  %v169_v22 = vmul.f32 %v2400_v21, %v2210_v16 }
  0xf3   :  { %659 = vrot.lane.b32.xlu1 %v652_v50, %s2168_s24  ;;  %v732_v50 = vsel %vm212_vm9, %v729_v32, %v731_v33  ;;  %v2492_v33 = vmul.f32 %v2346_v53, %v2206_v14 }
  0xf4   :  { %695 = vrot.lane.b32.xlu0 %v687_v54, %s2168_s24  ;;  %655 = vrot.lane.b32.xlu2 %v647_v55, %s2168_s24  ;;  %v2457_v54 = vmul.f32 %v750_v43, %v2206_v14  ;;  %v161_v55 = vadd.f32 %v149_v49, %v128_v39  ;;  %v756_v39 = vmul.f32 %v750_v43, %v2230_v36 }
  0xf5   :  { %v753_v49 = vmul.f32 %v750_v43, %v2210_v16 }
  0xf6   :  { %v2367_v62 = vpop.permute.xlu2 %573  ;;  %v769_v13 = vrot.slane %v2457_v54, 5  ;;  %v279_v54 = vrot.slane %v266_v19, 6  ;;  %v806_v19 = vrot.slane %v793_v48, 6  ;;  %v106_v48 = vmul.f32 %v2346_v53, %v2230_v36 }
  0xf7   :  { %v766_v20 = vrot.slane %v753_v49, 5 }
  0xf8   :  { %v770_v42 = vsel %vm245_vm10, %v768_v23, %v769_v13  ;;  %v96_v23 = vmul.f32 %v2376_v4, %v2208_v15 }
  0xfb   :  { %697 = vrot.lane.b32.xlu1 %v690_v10, %s2168_s24  ;;  %v3159_v10 = vrot.slane %v2444_v46, 6 }
  0xfc   :  { %733 = vrot.lane.b32.xlu0 %v725_v17, %s2168_s24  ;;  %693 = vrot.lane.b32.xlu2 %v685_v12, %s2168_s24  ;;  %v182_v12 = vsel %vm179_vm8, %v180_v58, %v181_v44 }
  0xfd   :  { %v2407_v24 = vpop.permute.xlu0 %311  ;;  %v194_v17 = vadd.f32 %v182_v12, %v161_v55  ;;  %v136_v55 = vmul.f32 %v2372_v1, %v2210_v16  ;;  %v2523_v58 = vsel %vm278_vm11, %v279_v54, %v3159_v10  ;;  %v137_v54 = vmul.f32 %v2372_v1, %v2198_v8 }
  0xfe   :  { %v2418_v28 = vpop.permute.xlu2 %579 }
 0x103   :  { %735 = vrot.lane.b32.xlu1 %v727_v47, %s2168_s24  ;;  %v730_v47 = vsel %vm212_vm9, %v728_v27, %v729_v32  ;;  %v104_v32 = vmul.f32 %v2346_v53, %v2198_v8  ;;  %v150_v27 = vrot.slane %v136_v55, 2  ;;  %v2567_v53 = vmul.f32 %v2400_v21, %v2206_v14 }
 0x104   :  { %739 = vrot.lane.b32.xlu0 %v732_v50, %s2168_s24  ;;  %699 = vrot.lane.b32.xlu2 %v692_v51, %s2168_s24  ;;  %v215_v50 = vsel %vm212_vm9, %v213_v18, %v214_v0  ;;  %v246_v51 = vrot.slane %v233_v52, 5  ;;  %v771_v52 = vrot.slane %v756_v39, 5  ;;  %v804_v18 = vrot.slane %v2498_v41, 6 }
 0x105   :  { %v2464_v60 = vpop.permute.xlu1 %313  ;;  %v227_v56 = vadd.f32 %v215_v50, %v194_v17  ;;  %v120_v17 = vrot.slane %v2492_v33, 1  ;;  %v2543_v33 = vmul.f32 %v2427_v37, %v2210_v16  ;;  %v2547_v41 = vmul.f32 %v2372_v1, %v2206_v14 }
 0x106   :  { %v2471_v3 = vpop.permute.xlu0 %575  ;;  %v2473_v7 = vpop.permute.xlu2 %347  ;;  %v248_v43 = vsel %vm245_vm10, %v246_v51, %v3160_v2  ;;  %v772_v49 = vsel %vm245_vm10, %v769_v13, %v771_v52  ;;  %v2557_v50 = vmul.f32 %v2488_v29, %v2206_v14  ;;  %v807_v59 = vsel %vm278_vm11, %v804_v18, %v806_v19 }
 0x107   :  { %v260_v39 = vadd.f32 %v248_v43, %v227_v56  ;;  %v97_v13 = vmul.f32 %v2376_v4, %v2198_v8  ;;  %v794_v55 = vmul.f32 %v2488_v29, %v2198_v8  ;;  %v151_v56 = vsel %vm146_vm7, %v148_v31, %v150_v27 }
 0x108   :  { %v809_v6 = vrot.slane %v2557_v50, 6  ;;  %v152_v31 = vrot.slane %v137_v54, 2  ;;  %v170_v27 = vmul.f32 %v2400_v21, %v2198_v8  ;;  %v2603_v50 = vmul.f32 %v2427_v37, %v2206_v14 }
 0x109   :  { %v98_v2 = vmul.f32 %v2376_v4, %v2206_v14 }
 0x10b   :  { %773 = vrot.lane.b32.xlu1 %v765_v34, %s2168_s24  ;;  %v2539_v34 = vmul.f32 %v2414_v26, %v2210_v16 }
 0x10c   :  { %777 = vrot.lane.b32.xlu0 %v770_v42, %s2168_s24  ;;  %737 = vrot.lane.b32.xlu2 %v730_v47, %s2168_s24  ;;  %v119_v42 = vrot.slane %v104_v32, 1  ;;  %v118_v47 = vsel %vm113_vm6, %v115_v5, %v117_v61  ;;  %v767_v5 = vsel %vm245_vm10, %v764_v9, %v766_v20  ;;  %v183_v9 = vrot.slane %v169_v22, 3 }
 0x10d   :  { %v2515_v57 = vpop.permute.xlu1 %577  ;;  %v153_v32 = vrot.slane %v2547_v41, 2  ;;  %v791_v61 = vmul.f32 %v2488_v29, %v2200_v11  ;;  %v216_v52 = vrot.slane %v2539_v34, 4  ;;  %v122_v20 = vrot.slane %v106_v48, 1 }
 0x10e   :  { %v2525_v63 = vpop.permute.xlu0 %349  ;;  %v2527_v12 = vpop.permute.xlu2 %353  ;;  %v121_v51 = vsel %vm113_vm6, %v119_v42, %v120_v17  ;;  %v2592_v22 = vstv %s2531_s14  ;;  %v186_v41 = vrot.slane %v2567_v53, 3  ;;  %v139_v48 = vmul.f32 %v2372_v1, %v2230_v36  ;;  %s2046_s14 = sld [smem:[#allocation3 + $0x1b]] }
 0x10f   :  { %v130_v19 = vadd.f32 %v121_v51, %v97_v13  ;;  %v808_v51 = vrot.slane %v794_v55, 6  ;;  %v803_v54 = vrot.slane %v791_v61, 6  ;;  %v123_v13 = vsel %vm113_vm6, %v120_v17, %v122_v20 }
 0x110   :  { %v831_v1 = vmul.f32 %v2592_v22, %v2200_v11  ;;  %v185_v55 = vrot.slane %v170_v27, 3  ;;  %v796_v61 = vmul.f32 %v2488_v29, %v2230_v36  ;;  %v249_v17 = vrot.slane %v2543_v33, 5 }
 0x111   :  { %v810_v10 = vsel %vm278_vm11, %v808_v51, %v809_v6  ;;  %v155_v20 = vrot.slane %v139_v48, 2  ;;  %v172_v51 = vmul.f32 %v2400_v21, %v2230_v36  ;;  %v184_v4 = vsel %vm179_vm8, %v181_v44, %v183_v9 }
 0x112   :  { %v187_v29 = vsel %vm179_vm8, %v185_v55, %v186_v41  ;;  %v2637_v21 = vmul.f32 %v2430_v38, %v2210_v16  ;;  %v2641_v33 = vmul.f32 %v2430_v38, %v2206_v14  ;;  %v252_v9 = vrot.slane %v2603_v50, 5 }
 0x113   :  { %779 = vrot.lane.b32.xlu1 %v772_v49, %s2168_s24  ;;  %v188_v48 = vrot.slane %v172_v51, 3 }
 0x114   :  { %815 = vrot.lane.b32.xlu0 %v807_v59, %s2168_s24  ;;  %775 = vrot.lane.b32.xlu2 %v767_v5, %s2168_s24  ;;  %v129_v59 = vadd.f32 %v118_v47, %v96_v23  ;;  %v2597_v5 = vmul.f32 %v2414_v26, %v2206_v14  ;;  %v154_v23 = vsel %vm146_vm7, %v152_v31, %v153_v32 }
 0x115   :  { %v2579_v43 = vpop.permute.xlu1 %351  ;;  %v203_v47 = vmul.f32 %v2414_v26, %v2198_v8  ;;  %v163_v53 = vadd.f32 %v154_v23, %v130_v19  ;;  %v805_v31 = vsel %vm278_vm11, %v803_v54, %v804_v18  ;;  %v2621_v19 = vadd.f32 %v2523_v58, %v260_v39 }
 0x116   :  { %v2584_v42 = vpop.permute.xlu0 %387  ;;  %v2586_v49 = vpop.permute.xlu2 %391  ;;  %v131_v58 = vadd.f32 %v123_v13, %v98_v2  ;;  %v162_v39 = vadd.f32 %v151_v56, %v129_v59  ;;  %v236_v56 = vmul.f32 %v2427_v37, %v2198_v8  ;;  %v811_v59 = vrot.slane %v796_v61, 6 }
 0x117   :  { %v196_v25 = vadd.f32 %v187_v29, %v163_v53  ;;  %v218_v2 = vrot.slane %v203_v47, 4  ;;  %v205_v23 = vmul.f32 %v2414_v26, %v2230_v36  ;;  %v156_v54 = vsel %vm146_vm7, %v153_v32, %v155_v20 }
 0x118   :  { %v164_v13 = vadd.f32 %v156_v54, %v131_v58  ;;  %v856_v47 = vstv %s2608_s15  ;;  %v195_v55 = vadd.f32 %v184_v4, %v162_v39  ;;  %v834_v61 = vmul.f32 %v2592_v22, %v2206_v14  ;;  %s2047_s15 = sld [smem:[#allocation3 + $0x22]] }
 0x119   :  { %v2664_v51 = vmul.f32 %v856_v47, %v2208_v15  ;;  %v285_v26 = vrot.slane %v2641_v33, 6  ;;  %v251_v32 = vrot.slane %v236_v56, 5  ;;  %v812_v20 = vsel %vm278_vm11, %v809_v6, %v811_v59 }
 0x11a   :  { %v2670_v29 = vmul.f32 %v856_v47, %v2206_v14  ;;  %v221_v58 = vrot.slane %v205_v23, 4  ;;  %v238_v4 = vmul.f32 %v2427_v37, %v2230_v36  ;;  %v189_v39 = vsel %vm179_vm8, %v186_v41, %v188_v48 }
 0x11b   :  { %817 = vrot.lane.b32.xlu1 %v810_v10, %s2168_s24  ;;  %v219_v10 = vrot.slane %v2597_v5, 4  ;;  %v269_v5 = vmul.f32 %v2430_v38, %v2198_v8  ;;  %v197_v56 = vadd.f32 %v189_v39, %v164_v13  ;;  %v860_v23 = vmul.f32 %v856_v47, %v2198_v8 }
 0x11c   :  { %839 = vrot.lane.b32.xlu0 %v831_v1, %s2169_s16  ;;  %813 = vrot.lane.b32.xlu2 %v805_v31, %s2168_s24  ;;  %v832_v1 = vmul.f32 %v2592_v22, %v2208_v15  ;;  %v217_v37 = vsel %vm212_vm9, %v214_v0, %v216_v52  ;;  %v3161_v41 = vrot.slane %v2434_v40, 5  ;;  %v875_v0 = vrot.slane %v2670_v29, 1 }
 0x11d   :  { %v2633_v18 = vpop.permute.xlu1 %389  ;;  %v220_v53 = vsel %vm212_vm9, %v218_v2, %v219_v10  ;;  %v253_v2 = vsel %vm245_vm10, %v251_v32, %v252_v9  ;;  %v284_v6 = vrot.slane %v269_v5, 6  ;;  %v870_v5 = vrot.slane %v2664_v51, 1 }
 0x11e   :  { %v2643_v27 = vpop.permute.xlu0 %393  ;;  %v2645_v44 = vpop.permute.xlu2 %429  ;;  %v229_v31 = vadd.f32 %v220_v53, %v196_v25  ;;  %v857_v25 = vmul.f32 %v856_v47, %v2200_v11  ;;  %v250_v48 = vsel %vm245_vm10, %v3161_v41, %v249_v17  ;;  %v228_v13 = vadd.f32 %v217_v37, %v195_v55 }
 0x11f   :  { %v286_v35 = vsel %vm278_vm11, %v284_v6, %v285_v26  ;;  %v254_v34 = vrot.slane %v238_v4, 5  ;;  %v271_v40 = vmul.f32 %v2430_v38, %v2230_v36  ;;  %v222_v52 = vsel %vm212_vm9, %v219_v10, %v221_v58 }
 0x120   :  { %v262_v11 = vadd.f32 %v253_v2, %v229_v31  ;;  %v869_v17 = vrot.slane %v857_v25, 1  ;;  %v230_v31 = vadd.f32 %v222_v52, %v197_v56  ;;  %v862_v51 = vmul.f32 %v856_v47, %v2230_v36  ;;  %v2762_v52 = vld [vmem:[#allocation2] sm:$0xff] }
 0x121   :  { %v2703_v55 = vstv %s2659_s17  ;;  %v319_v38 = vadd.f32 %v2326_v30, %v2621_v19  ;;  %v859_v4 = vmul.f32 %v856_v47, %v2210_v16  ;;  %v261_v39 = vadd.f32 %v250_v48, %v228_v13  ;;  %s2049_s17 = sld [smem:[#allocation3 + $0x30]] }
 0x122   :  { %v871_v32 = vsel %vm113_vm6, %v869_v17, %v870_v5  ;;  %v2710_v29 = vmul.f32 %v2703_v55, %v2208_v15  ;;  %v899_v58 = vmul.f32 %v2703_v55, %v2210_v16  ;;  %v255_v25 = vsel %vm245_vm10, %v252_v9, %v254_v34 }
 0x123   :  { %841 = vrot.lane.b32.xlu1 %v832_v1, %s2169_s16  ;;  %v282_v1 = vrot.slane %v2637_v21, 6  ;;  %v295_v21 = vadd.f32 %v286_v35, %v262_v11  ;;  %v263_v30 = vadd.f32 %v255_v25, %v230_v31  ;;  %v359_v19 = vadd.f32 %v2473_v7, %v319_v38 }
 0x124   :  { %845 = vrot.lane.b32.xlu0 %v834_v61, %s2169_s16  ;;  %819 = vrot.lane.b32.xlu2 %v812_v20, %s2168_s24  ;;  %v874_v61 = vrot.slane %v860_v23, 1  ;;  %v833_v20 = vmul.f32 %v2592_v22, %v2198_v8  ;;  %v287_v22 = vrot.slane %v271_v40, 6  ;;  %v877_v6 = vrot.slane %v862_v51, 1  ;;  %s2031_s24 = sld [smem:[#allocation3 + $0x12]] }
 0x125   :  { %v428_v59 = vpop.permute.xlu1 %427  ;;  %v321_v8 = vadd.f32 %v2407_v24, %v295_v21  ;;  %v3162_v56 = vrot.slane %v2444_v46, 6  ;;  %v399_v9 = vadd.f32 %v2584_v42, %v359_v19  ;;  %v910_v23 = vrot.slane %v2710_v29, 2 }
 0x126   :  { %v432_v54 = vpop.permute.xlu0 %431  ;;  %v2690_v53 = vpop.permute.xlu2 %467  ;;  %v876_v10 = vsel %vm113_vm6, %v874_v61, %v875_v0  ;;  %v912_v37 = vrot.slane %v899_v58, 2  ;;  %v872_v41 = vrot.slane %v859_v4, 1  ;;  %v288_v7 = vsel %vm278_vm11, %v285_v26, %v287_v22 }
 0x127   :  { %v283_v16 = vsel %vm278_vm11, %v3162_v56, %v282_v1  ;;  %v361_v24 = vadd.f32 %v2579_v43, %v321_v8  ;;  %v296_v11 = vadd.f32 %v288_v7, %v263_v30  ;;  %v439_v46 = vadd.f32 %v428_v59, %v399_v9  ;;  %v2777_v8 = vld [vmem:[#allocation2 + $0x20] sm:$0xff] }
 0x128   :  { %v294_v48 = vadd.f32 %v283_v16, %v261_v39  ;;  %v878_v13 = vsel %vm113_vm6, %v875_v0, %v877_v6  ;;  %v2742_v42 = vmul.f32 %v2703_v55, %v2206_v14  ;;  %v2745_v35 = vstv %s2712_s0  ;;  %v2756_v14 = vld [vmem:[#allocation2 + $0x18] sm:$0xff]  ;;  %s2173_s0 = smov [#allocation8]  }
 0x129   :  { %v401_v43 = vadd.f32 %v2586_v49, %v361_v24  ;;  %v322_v34 = vadd.f32 %v2464_v60, %v296_v11  ;;  %v913_v33 = vsel %vm146_vm7, %v910_v23, %v912_v37  ;;  %v873_v26 = vsel %vm113_vm6, %v870_v5, %v872_v41 }
 0x12a   :  { %v320_v1 = vadd.f32 %v2338_v45, %v294_v48  ;;  %v938_v59 = vmul.f32 %v2745_v35, %v2208_v15  ;;  %v900_v60 = vmul.f32 %v2756_v14, %v2703_v55  ;;  %v479_v40 = vadd.f32 %v2690_v53, %v439_v46 }
 0x12b   :  { %879 = vrot.lane.b32.xlu1 %v871_v32, %s2169_s16  ;;  %v441_v49 = vadd.f32 %v432_v54, %v401_v43  ;;  %v362_v0 = vadd.f32 %v2527_v12, %v322_v34  ;;  %v937_v15 = vmul.f32 %v2762_v52, %v2745_v35  ;;  %v915_v51 = vrot.slane %v2742_v42, 2 }
 0x12c   :  { %883 = vrot.lane.b32.xlu0 %v876_v10, %s2169_s16  ;;  %843 = vrot.lane.b32.xlu2 %v833_v20, %s2169_s16  ;;  %v360_v45 = vadd.f32 %v2525_v63, %v320_v1  ;;  %v897_v63 = vmul.f32 %v2762_v52, %v2703_v55  ;;  %v950_v53 = vrot.slane %v938_v59, 3  ;;  %v914_v20 = vrot.slane %v900_v60, 2 }
 0x12d   :  { %v434_v2 = vpop.permute.xlu1 %433  ;;  %v402_v12 = vadd.f32 %v2643_v27, %v362_v0  ;;  %v949_v38 = vrot.slane %v937_v15, 3  ;;  %v941_v27 = vmul.f32 %v2777_v8, %v2745_v35  ;;  %v902_v30 = vmul.f32 %v2703_v55, %v2230_v36  ;;  %v2791_v55 = vld [vmem:[#allocation2 + $0x8] sm:$0xff] }
 0x12e   :  { %v470_v47 = vpop.permute.xlu0 %469  ;;  %v474_v50 = vpop.permute.xlu2 %473  ;;  %v400_v54 = vadd.f32 %v2633_v18, %v360_v45  ;;  %v909_v10 = vrot.slane %v897_v63, 2  ;;  %v916_v4 = vsel %vm146_vm7, %v914_v20, %v915_v51  ;;  %v2773_v18 = vld [vmem:[#allocation2 + $0x10] sm:$0x3f]  ;;  %v976_v11 = vstv %s2026_s1  ;;  %s1986_s1 = sshll.u32 %s2173_s0, 4  ;;  %s1987_s1 = int_to_ptr.vmem [resolvable:$true] %s1986_s1 }
 0x12f   :  { %v442_v29 = vadd.f32 %v434_v2, %v402_v12  ;;  %v939_v39 = vmul.f32 %v2773_v18, %v2745_v35  ;;  %v951_v22 = vsel %vm179_vm8, %v949_v38, %v950_v53  ;;  %v955_v41 = vrot.slane %v941_v27, 3 }
 0x130   :  { %v440_v58 = vadd.f32 %v2645_v44, %v400_v54  ;;  %v911_v25 = vsel %vm146_vm7, %v909_v10, %v910_v23  ;;  %v942_v44 = vmul.f32 %v2745_v35, %v2230_v36  ;;  %v917_v48 = vrot.slane %v902_v30, 2 }
 0x131   :  { %v482_v2 = vadd.f32 %v474_v50, %v442_v29  ;;  %v952_v9 = vrot.slane %v939_v39, 3  ;;  %v977_v1 = vmul.f32 %v2762_v52, %v976_v11  ;;  %v980_v42 = vmul.f32 %v2756_v14, %v976_v11 }
 0x132   :  { %v480_v19 = vadd.f32 %v470_v47, %v440_v58  ;;  %v957_v23 = vrot.slane %v942_v44, 3  ;;  %v978_v47 = vmul.f32 %v2791_v55, %v976_v11  ;;  %v918_v46 = vsel %vm146_vm7, %v915_v51, %v917_v48 }
 0x133   :  { %885 = vrot.lane.b32.xlu1 %v878_v13, %s2169_s16  ;;  %v953_v36 = vsel %vm179_vm8, %v950_v53, %v952_v9  ;;  %v981_v13 = vmul.f32 %v2777_v8, %v976_v11  ;;  %v940_v34 = vmul.f32 %v2756_v14, %v2745_v35  ;;  %v989_v0 = vrot.slane %v977_v1, 4 }
 0x134   :  { %921 = vrot.lane.b32.xlu0 %v913_v33, %s2169_s16  ;;  %881 = vrot.lane.b32.xlu2 %v873_v26, %s2169_s16  ;;  %v958_v50 = vsel %vm179_vm8, %v955_v41, %v957_v23  ;;  %v990_v45 = vrot.slane %v978_v47, 4  ;;  %v1016_v63 = vstv %s2027_s20  ;;  %v1056_v44 = vstv %s2028_s21 }
 0x135   :  { %v472_v5 = vpop.permute.xlu1 %471  ;;  %v995_v60 = vrot.slane %v981_v13, 4  ;;  %v954_v15 = vrot.slane %v940_v34, 3  ;;  %v1018_v35 = vmul.f32 %v2791_v55, %v1016_v63  ;;  %v1017_v9 = vmul.f32 %v2762_v52, %v1016_v63 }
 0x136   :  { %v481_v17 = vadd.f32 %v472_v5, %v441_v49  ;;  %v508_v31 = vpop.permute.xlu0 %507  ;;  %v512_v61 = vpop.permute.xlu2 %511  ;;  %v994_v5 = vrot.slane %v980_v42, 4  ;;  %v991_v54 = vsel %vm212_vm9, %v989_v0, %v990_v45 }
 0x137   :  { %v519_v21 = vadd.f32 %v508_v31, %v479_v40  ;;  %v1029_v13 = vrot.slane %v1017_v9, 5 }
 0x138   :  { %v521_v32 = vadd.f32 %v512_v61, %v481_v17  ;;  %v2806_v17 = vld [vmem:[#allocation2 + $0x28] sm:$0x3f]  ;;  %v1019_v61 = vmul.f32 %v2773_v18, %v1016_v63  ;;  %v996_v12 = vsel %vm212_vm9, %v994_v5, %v995_v60 }
 0x139   :  { %v982_v31 = vmul.f32 %v2806_v17, %v976_v11  ;;  %v1062_v42 = vmul.f32 %v2806_v17, %v1056_v44  ;;  %v1022_v34 = vmul.f32 %v2806_v17, %v1016_v63 }
 0x13a   :  { %v1032_v39 = vrot.slane %v1019_v61, 5  ;;  %v1060_v61 = vmul.f32 %v2756_v14, %v1056_v44 }
 0x13b   :  { %923 = vrot.lane.b32.xlu1 %v916_v4, %s2169_s16  ;;  %v997_v10 = vrot.slane %v982_v31, 4  ;;  %v1030_v4 = vrot.slane %v1018_v35, 5  ;;  %v1037_v5 = vrot.slane %v1022_v34, 5 }
 0x13c   :  { %959 = vrot.lane.b32.xlu0 %v951_v22, %s2169_s16  ;;  %919 = vrot.lane.b32.xlu2 %v911_v25, %s2169_s16  ;;  %v1021_v25 = vmul.f32 %v2777_v8, %v1016_v63 }
 0x13d   :  { %v510_v6 = vpop.permute.xlu1 %509  ;;  %v998_v22 = vsel %vm212_vm9, %v995_v60, %v997_v10  ;;  %v1033_v30 = vsel %vm245_vm10, %v1030_v4, %v1032_v39  ;;  %v1122_v10 = vstv %s2030_s23 }
 0x13e   :  { %v520_v56 = vadd.f32 %v510_v6, %v480_v19  ;;  %v514_v16 = vpop.permute.xlu0 %513  ;;  %v550_v24 = vpop.permute.xlu2 %549  ;;  %v1020_v6 = vmul.f32 %v2756_v14, %v1016_v63  ;;  %v1035_v48 = vrot.slane %v1021_v25, 5  ;;  %v1125_v39 = vmul.f32 %v2773_v18, %v1122_v10 }
 0x13f   :  { %v522_v37 = vadd.f32 %v514_v16, %v482_v2 }
 0x140   :  { %v560_v7 = vadd.f32 %v550_v24, %v520_v56  ;;  %v1057_v24 = vmul.f32 %v2762_v52, %v1056_v44  ;;  %v1034_v47 = vrot.slane %v1020_v6, 5  ;;  %v1038_v31 = vsel %vm245_vm10, %v1035_v48, %v1037_v5 }
 0x142   :  { %v586_v2 = vadd.f32 %v2471_v3, %v560_v7  ;;  %v1036_v3 = vsel %vm245_vm10, %v1034_v47, %v1035_v48  ;;  %v1059_v7 = vmul.f32 %v2773_v18, %v1056_v44 }
 0x143   :  { %961 = vrot.lane.b32.xlu1 %v953_v36, %s2169_s16 }
 0x144   :  { %965 = vrot.lane.b32.xlu0 %v958_v50, %s2169_s16  ;;  %925 = vrot.lane.b32.xlu2 %v918_v46, %s2169_s16  ;;  %v1069_v46 = vrot.slane %v1057_v24, 6  ;;  %v1162_v24 = vstv %s2031_s24 }
 0x145   :  { %v548_v43 = vpop.permute.xlu1 %547  ;;  %v1163_v48 = vmul.f32 %v2762_v52, %v1162_v24  ;;  %v1165_v34 = vmul.f32 %v2773_v18, %v1162_v24 }
 0x146   :  { %v559_v33 = vadd.f32 %v548_v43, %v519_v21  ;;  %v552_v26 = vpop.permute.xlu0 %551  ;;  %v618_v59 = vpop.permute.xlu2 %617  ;;  %v979_v21 = vmul.f32 %v2773_v18, %v976_v11  ;;  %v1031_v43 = vsel %vm245_vm10, %v1029_v13, %v1030_v4  ;;  %v1124_v4 = vmul.f32 %v2791_v55, %v1122_v10 }
 0x147   :  { %v561_v49 = vadd.f32 %v552_v26, %v521_v32 }
 0x148   :  { %v585_v32 = vadd.f32 %v2367_v62, %v559_v33  ;;  %v992_v27 = vrot.slane %v979_v21, 4  ;;  %v1058_v62 = vmul.f32 %v2791_v55, %v1056_v44  ;;  %v1096_v21 = vstv %s2029_s22  ;;  %s1988_s22 = sshll.u32 %s3158_s2, 4  ;;  %s1989_s22 = int_to_ptr.hbm [resolvable:$true] %s1988_s22 }
 0x149   :  { %v587_v40 = vadd.f32 %v2515_v57, %v561_v49  ;;  %v956_v57 = vsel %vm179_vm8, %v954_v15, %v955_v41  ;;  %v1072_v49 = vrot.slane %v1059_v7, 6  ;;  %v1100_v6 = vmul.f32 %v2777_v8, %v1096_v21 }
 0x14a   :  { %v993_v19 = vsel %vm212_vm9, %v990_v45, %v992_v27  ;;  %v1070_v36 = vrot.slane %v1058_v62, 6  ;;  %v1138_v62 = vrot.slane %v1125_v39, 1 }
 0x14b   :  { %v627_v51 = vadd.f32 %v618_v59, %v587_v40  ;;  %999 = vrot.lane.b32.xlu1 %v991_v54, %s2169_s16  ;;  %v1077_v40 = vrot.slane %v1062_v42, 6 }
 0x14c   :  { %1003 = vrot.lane.b32.xlu0 %v996_v12, %s2169_s16  ;;  %963 = vrot.lane.b32.xlu2 %v956_v57, %s2169_s16  ;;  %v1071_v1 = vsel %vm278_vm11, %v1069_v46, %v1070_v36  ;;  %v1073_v54 = vsel %vm278_vm11, %v1070_v36, %v1072_v49  ;;  %v1128_v49 = vmul.f32 %v2806_v17, %v1122_v10 }
 0x14d   :  { %v554_v53 = vpop.permute.xlu1 %553 }
 0x14e   :  { %v562_v20 = vadd.f32 %v554_v53, %v522_v37  ;;  %v614_v29 = vpop.permute.xlu0 %613  ;;  %v656_v38 = vpop.permute.xlu2 %655 }
 0x14f   :  { %v625_v58 = vadd.f32 %v614_v29, %v585_v32  ;;  %v1074_v29 = vrot.slane %v1060_v61, 6 }
 0x150   :  { %v588_v16 = vadd.f32 %v2418_v28, %v562_v20  ;;  %v1061_v28 = vmul.f32 %v2777_v8, %v1056_v44  ;;  %v1097_v20 = vmul.f32 %v2762_v52, %v1096_v21 }
 0x152   :  { %v1075_v0 = vrot.slane %v1061_v28, 6 }
 0x153   :  { %1005 = vrot.lane.b32.xlu1 %v998_v22, %s2169_s16 }
 0x154   :  { %1041 = vrot.lane.b32.xlu0 %v1033_v30, %s2169_s16  ;;  %1001 = vrot.lane.b32.xlu2 %v993_v19, %s2169_s16  ;;  %v1078_v63 = vsel %vm278_vm11, %v1075_v0, %v1077_v40  ;;  %v1136_v19 = vrot.slane %v1124_v4, 1 }
 0x155   :  { %v616_v56 = vpop.permute.xlu1 %615 }
 0x156   :  { %v626_v37 = vadd.f32 %v616_v56, %v586_v2  ;;  %v620_v41 = vpop.permute.xlu0 %619  ;;  %v694_v23 = vpop.permute.xlu2 %693  ;;  %v1098_v56 = vmul.f32 %v2791_v55, %v1096_v21  ;;  %v1139_v9 = vsel %vm113_vm6, %v1136_v19, %v1138_v62 }
 0x157   :  { %v628_v11 = vadd.f32 %v620_v41, %v588_v16  ;;  %v1127_v16 = vmul.f32 %v2777_v8, %v1122_v10  ;;  %v1126_v41 = vmul.f32 %v2756_v14, %v1122_v10 }
 0x158   :  { %v666_v50 = vadd.f32 %v656_v38, %v626_v37  ;;  %v1099_v38 = vmul.f32 %v2756_v14, %v1096_v21  ;;  %v1164_v37 = vmul.f32 %v2791_v55, %v1162_v24 }
 0x159   :  { %v1141_v46 = vrot.slane %v1127_v16, 1  ;;  %v1140_v7 = vrot.slane %v1126_v41, 1 }
 0x15b   :  { %1043 = vrot.lane.b32.xlu1 %v1036_v3, %s2169_s16  ;;  %v1176_v3 = vrot.slane %v1164_v37, 2  ;;  %v1142_v42 = vsel %vm113_vm6, %v1140_v7, %v1141_v46 }
 0x15c   :  { %1079 = vrot.lane.b32.xlu0 %v1071_v1, %s2169_s16  ;;  %1039 = vrot.lane.b32.xlu2 %v1031_v43, %s2169_s16  ;;  %v1175_v1 = vrot.slane %v1163_v48, 2 }
 0x15d   :  { %v654_v33 = vpop.permute.xlu1 %653 }
 0x15e   :  { %v665_v26 = vadd.f32 %v654_v33, %v625_v58  ;;  %v658_v59 = vpop.permute.xlu0 %657  ;;  %v700_v45 = vpop.permute.xlu2 %699  ;;  %v1076_v58 = vsel %vm278_vm11, %v1074_v29, %v1075_v0  ;;  %v1167_v33 = vmul.f32 %v2777_v8, %v1162_v24 }
 0x15f   :  { %v667_v60 = vadd.f32 %v658_v59, %v627_v51 }
 0x160   :  { %v705_v15 = vadd.f32 %v694_v23, %v665_v26  ;;  %v1177_v26 = vsel %vm146_vm7, %v1175_v1, %v1176_v3 }
 0x163   :  { %1081 = vrot.lane.b32.xlu1 %v1073_v54, %s2169_s16 }
 0x164   :  { %1085 = vrot.lane.b32.xlu0 %v1078_v63, %s2169_s16  ;;  %1045 = vrot.lane.b32.xlu2 %v1038_v31, %s2169_s16  ;;  %v1181_v63 = vrot.slane %v1167_v33, 2 }
 0x165   :  { %v660_v35 = vpop.permute.xlu1 %659 }
 0x166   :  { %v668_v51 = vadd.f32 %v660_v35, %v628_v11  ;;  %v696_v12 = vpop.permute.xlu0 %695  ;;  %v738_v57 = vpop.permute.xlu2 %737  ;;  %v1123_v11 = vmul.f32 %v2762_v52, %v1122_v10  ;;  %v1143_v35 = vrot.slane %v1128_v49, 1  ;;  %v1166_v10 = vmul.f32 %v2756_v14, %v1162_v24 }
 0x167   :  { %v706_v53 = vadd.f32 %v696_v12, %v666_v50 }
 0x168   :  { %v708_v32 = vadd.f32 %v700_v45, %v668_v51  ;;  %v1135_v43 = vrot.slane %v1123_v11, 1  ;;  %v1168_v45 = vmul.f32 %v2806_v17, %v1162_v24  ;;  %v1202_v51 = vstv %s2032_s26 }
 0x169   :  { %v1180_v62 = vrot.slane %v1166_v10, 2  ;;  %v1205_v41 = vmul.f32 %v2773_v18, %v1202_v51 }
 0x16a   :  { %v1137_v59 = vsel %vm113_vm6, %v1135_v43, %v1136_v19  ;;  %v1183_v31 = vrot.slane %v1168_v45, 2  ;;  %v1282_v43 = vstv %s2034_s28 }
 0x16b   :  { %1105 = vrot.lane.b32.xlu1 %v1097_v20, %s2170_s25  ;;  %v1203_v20 = vmul.f32 %v2762_v52, %v1202_v51  ;;  %v1284_v33 = vmul.f32 %v2791_v55, %v1282_v43  ;;  %v1283_v45 = vmul.f32 %v2762_v52, %v1282_v43 }
 0x16c   :  { %1109 = vrot.lane.b32.xlu0 %v1099_v38, %s2170_s25  ;;  %1083 = vrot.lane.b32.xlu2 %v1076_v58, %s2169_s16  ;;  %v1184_v21 = vsel %vm146_vm7, %v1181_v63, %v1183_v31  ;;  %v1206_v38 = vmul.f32 %v2756_v14, %v1202_v51  ;;  %s2048_s16 = sld [smem:[#allocation3 + $0x29]] }
 0x16d   :  { %v698_v27 = vpop.permute.xlu1 %697 }
 0x16e   :  { %v707_v22 = vadd.f32 %v698_v27, %v667_v60  ;;  %v734_v25 = vpop.permute.xlu0 %733  ;;  %v776_v44 = vpop.permute.xlu2 %775  ;;  %v1220_v19 = vrot.slane %v1206_v38, 3 }
 0x16f   :  { %v745_v30 = vadd.f32 %v734_v25, %v705_v15  ;;  %v1178_v15 = vrot.slane %v1165_v34, 2 }
 0x170   :  { %v747_v2 = vadd.f32 %v738_v57, %v707_v22  ;;  %v1204_v57 = vmul.f32 %v2791_v55, %v1202_v51 }
 0x171   :  { %v1179_v12 = vsel %vm146_vm7, %v1176_v3, %v1178_v15  ;;  %v1218_v3 = vrot.slane %v1205_v41, 3 }
 0x172   :  { %v1216_v27 = vrot.slane %v1204_v57, 3  ;;  %v1287_v57 = vmul.f32 %v2777_v8, %v1282_v43 }
 0x173   :  { %1111 = vrot.lane.b32.xlu1 %v1100_v6, %s2170_s25 }
 0x174   :  { %1147 = vrot.lane.b32.xlu0 %v1139_v9, %s2170_s25  ;;  %1107 = vrot.lane.b32.xlu2 %v1098_v56, %s2170_s25  ;;  %v1208_v56 = vmul.f32 %v2806_v17, %v1202_v51  ;;  %v1182_v9 = vsel %vm146_vm7, %v1180_v62, %v1181_v63  ;;  %v1219_v34 = vsel %vm179_vm8, %v1216_v27, %v1218_v3 }
 0x175   :  { %v736_v23 = vpop.permute.xlu1 %735 }
 0x176   :  { %v746_v36 = vadd.f32 %v736_v23, %v706_v53  ;;  %v740_v47 = vpop.permute.xlu0 %739  ;;  %v814_v50 = vpop.permute.xlu2 %813  ;;  %v1144_v53 = vsel %vm113_vm6, %v1141_v46, %v1143_v35  ;;  %v1295_v35 = vrot.slane %v1283_v45, 5 }
 0x177   :  { %v748_v13 = vadd.f32 %v740_v47, %v708_v32  ;;  %v1207_v32 = vmul.f32 %v2777_v8, %v1202_v51  ;;  %v1223_v47 = vrot.slane %v1208_v56, 3 }
 0x178   :  { %v786_v28 = vadd.f32 %v776_v44, %v746_v36  ;;  %v1215_v44 = vrot.slane %v1203_v20, 3 }
 0x179   :  { %v1221_v25 = vrot.slane %v1207_v32, 3  ;;  %v1288_v32 = vmul.f32 %v2806_v17, %v1282_v43 }
 0x17a   :  { %v1217_v6 = vsel %vm179_vm8, %v1215_v44, %v1216_v27  ;;  %v1301_v27 = vrot.slane %v1287_v57, 5 }
 0x17b   :  { %1149 = vrot.lane.b32.xlu1 %v1142_v42, %s2170_s25  ;;  %v1222_v24 = vsel %vm179_vm8, %v1220_v19, %v1221_v25 }
 0x17c   :  { %1185 = vrot.lane.b32.xlu0 %v1177_v26, %s2170_s25  ;;  %1145 = vrot.lane.b32.xlu2 %v1137_v59, %s2170_s25 }
 0x17d   :  { %v774_v60 = vpop.permute.xlu1 %773 }
 0x17e   :  { %v785_v0 = vadd.f32 %v774_v60, %v745_v30  ;;  %v778_v40 = vpop.permute.xlu0 %777  ;;  %v820_v5 = vpop.permute.xlu2 %819 }
 0x17f   :  { %v787_v54 = vadd.f32 %v778_v40, %v747_v2  ;;  %v1242_v2 = vstv %s2033_s27 }
 0x180   :  { %v825_v61 = vadd.f32 %v814_v50, %v785_v0  ;;  %v1244_v16 = vmul.f32 %v2791_v55, %v1242_v2  ;;  %v1245_v37 = vmul.f32 %v2773_v18, %v1242_v2  ;;  %v1247_v1 = vmul.f32 %v2777_v8, %v1242_v2 }
 0x181   :  { %v1246_v26 = vmul.f32 %v2756_v14, %v1242_v2  ;;  %v1243_v49 = vmul.f32 %v2762_v52, %v1242_v2  ;;  %v1248_v20 = vmul.f32 %v2806_v17, %v1242_v2 }
 0x182   :  { %v1256_v46 = vrot.slane %v1244_v16, 4 }
 0x183   :  { %1187 = vrot.lane.b32.xlu1 %v1179_v12, %s2170_s25  ;;  %v1260_v63 = vrot.slane %v1246_v26, 4  ;;  %v1285_v12 = vmul.f32 %v2773_v18, %v1282_v43 }
 0x184   :  { %1191 = vrot.lane.b32.xlu0 %v1184_v21, %s2170_s25  ;;  %1151 = vrot.lane.b32.xlu2 %v1144_v53, %s2170_s25 }
 0x185   :  { %v780_v29 = vpop.permute.xlu1 %779 }
 0x186   :  { %v788_v58 = vadd.f32 %v780_v29, %v748_v13  ;;  %v816_v4 = vpop.permute.xlu0 %815  ;;  %v844_v39 = vpop.permute.xlu2 %843  ;;  %v1258_v13 = vrot.slane %v1245_v37, 4  ;;  %v1286_v37 = vmul.f32 %v2756_v14, %v1282_v43 }
 0x187   :  { %v826_v22 = vadd.f32 %v816_v4, %v786_v28  ;;  %v1224_v28 = vsel %vm179_vm8, %v1221_v25, %v1223_v47  ;;  %v1298_v4 = vrot.slane %v1285_v12, 5  ;;  %v1263_v25 = vrot.slane %v1248_v20, 4 }
 0x188   :  { %v828_v30 = vadd.f32 %v820_v5, %v788_v58  ;;  %v1259_v42 = vsel %vm212_vm9, %v1256_v46, %v1258_v13  ;;  %v1261_v5 = vrot.slane %v1247_v1, 4  ;;  %v1300_v3 = vrot.slane %v1286_v37, 5 }
 0x18a   :  { %v1262_v51 = vsel %vm212_vm9, %v1260_v63, %v1261_v5  ;;  %v1302_v43 = vsel %vm245_vm10, %v1300_v3, %v1301_v27 }
 0x18b   :  { %1225 = vrot.lane.b32.xlu1 %v1217_v6, %s2170_s25  ;;  %v1264_v6 = vsel %vm212_vm9, %v1261_v5, %v1263_v25 }
 0x18c   :  { %1229 = vrot.lane.b32.xlu0 %v1222_v24, %s2170_s25  ;;  %1189 = vrot.lane.b32.xlu2 %v1182_v9, %s2170_s25 }
 0x18d   :  { %v818_v23 = vpop.permute.xlu1 %817 }
 0x18e   :  { %v827_v48 = vadd.f32 %v818_v23, %v787_v54  ;;  %v840_v11 = vpop.permute.xlu0 %839  ;;  %v882_v36 = vpop.permute.xlu2 %881  ;;  %v1296_v54 = vrot.slane %v1284_v33, 5 }
 0x18f   :  { %v851_v50 = vadd.f32 %v840_v11, %v825_v61  ;;  %v1255_v61 = vrot.slane %v1243_v49, 4 }
 0x190   :  { %v853_v7 = vadd.f32 %v844_v39, %v827_v48  ;;  %v1297_v21 = vsel %vm245_vm10, %v1295_v35, %v1296_v54  ;;  %v1299_v19 = vsel %vm245_vm10, %v1296_v54, %v1298_v4  ;;  %v1388_v54 = vstv %s2037_s3 }
 0x191   :  { %v1257_v53 = vsel %vm212_vm9, %v1255_v61, %v1256_v46  ;;  %v1389_v61 = vmul.f32 %v2762_v52, %v1388_v54  ;;  %v1393_v4 = vmul.f32 %v2777_v8, %v1388_v54 }
 0x193   :  { %1231 = vrot.lane.b32.xlu1 %v1224_v28, %s2170_s25 }
 0x194   :  { %1267 = vrot.lane.b32.xlu0 %v1259_v42, %s2170_s25  ;;  %1227 = vrot.lane.b32.xlu2 %v1219_v34, %s2170_s25 }
 0x195   :  { %v842_v59 = vpop.permute.xlu1 %841 }
 0x196   :  { %v852_v60 = vadd.f32 %v842_v59, %v826_v22  ;;  %v846_v0 = vpop.permute.xlu0 %845  ;;  %v920_v40 = vpop.permute.xlu2 %919  ;;  %v1303_v22 = vrot.slane %v1288_v32, 5 }
 0x197   :  { %v854_v15 = vadd.f32 %v846_v0, %v828_v30  ;;  %v1322_v30 = vstv %s2035_s29 }
 0x198   :  { %v892_v31 = vadd.f32 %v882_v36, %v852_v60  ;;  %v1324_v62 = vmul.f32 %v2791_v55, %v1322_v30  ;;  %v1304_v2 = vsel %vm245_vm10, %v1301_v27, %v1303_v22  ;;  %v1327_v56 = vmul.f32 %v2777_v8, %v1322_v30 }
 0x199   :  { %v1323_v16 = vmul.f32 %v2762_v52, %v1322_v30  ;;  %v1326_v9 = vmul.f32 %v2756_v14, %v1322_v30  ;;  %v1328_v28 = vmul.f32 %v2806_v17, %v1322_v30  ;;  %v1325_v42 = vmul.f32 %v2773_v18, %v1322_v30 }
 0x19a   :  { %v1336_v11 = vrot.slane %v1324_v62, 6  ;;  %v1341_v47 = vrot.slane %v1327_v56, 6  ;;  %v1407_v62 = vrot.slane %v1393_v4, 1  ;;  %v1428_v56 = vstv %s2038_s5 }
 0x19b   :  { %1269 = vrot.lane.b32.xlu1 %v1262_v51, %s2170_s25  ;;  %v1340_v13 = vrot.slane %v1326_v9, 6  ;;  %v1343_v45 = vrot.slane %v1328_v28, 6  ;;  %v1338_v60 = vrot.slane %v1325_v42, 6  ;;  %v1430_v9 = vmul.f32 %v2791_v55, %v1428_v56 }
 0x19c   :  { %1305 = vrot.lane.b32.xlu0 %v1297_v21, %s2170_s25  ;;  %1265 = vrot.lane.b32.xlu2 %v1257_v53, %s2170_s25 }
 0x19d   :  { %v880_v29 = vpop.permute.xlu1 %879  ;;  %v1342_v1 = vsel %vm278_vm11, %v1340_v13, %v1341_v47  ;;  %v1344_v5 = vsel %vm278_vm11, %v1341_v47, %v1343_v45  ;;  %v1339_v63 = vsel %vm278_vm11, %v1336_v11, %v1338_v60  ;;  %v1442_v13 = vrot.slane %v1430_v9, 2 }
 0x19e   :  { %v891_v38 = vadd.f32 %v880_v29, %v851_v50  ;;  %v884_v10 = vpop.permute.xlu0 %883  ;;  %v926_v58 = vpop.permute.xlu2 %925  ;;  %v1335_v50 = vrot.slane %v1323_v16, 6  ;;  %v1401_v29 = vrot.slane %v1389_v61, 1 }
 0x19f   :  { %v893_v39 = vadd.f32 %v884_v10, %v853_v7  ;;  %v1391_v10 = vmul.f32 %v2773_v18, %v1388_v54 }
 0x1a0   :  { %v931_v44 = vadd.f32 %v920_v40, %v891_v38  ;;  %v1337_v7 = vsel %vm278_vm11, %v1335_v50, %v1336_v11  ;;  %v1362_v40 = vstv %s2036_s30  ;;  %v1432_v11 = vmul.f32 %v2756_v14, %v1428_v56 }
 0x1a1   :  { %v1365_v20 = vmul.f32 %v2756_v14, %v1362_v40  ;;  %v1363_v38 = vmul.f32 %v2762_v52, %v1362_v40  ;;  %v1404_v30 = vrot.slane %v1391_v10, 1 }
 0x1a3   :  { %1307 = vrot.lane.b32.xlu1 %v1299_v19, %s2170_s25 }
 0x1a4   :  { %1311 = vrot.lane.b32.xlu0 %v1304_v2, %s2170_s25  ;;  %1271 = vrot.lane.b32.xlu2 %v1264_v6, %s2170_s25 }
 0x1a5   :  { %v886_v24 = vpop.permute.xlu1 %885 }
 0x1a6   :  { %v894_v41 = vadd.f32 %v886_v24, %v854_v15  ;;  %v922_v23 = vpop.permute.xlu0 %921  ;;  %v964_v48 = vpop.permute.xlu2 %963  ;;  %v1364_v15 = vmul.f32 %v2791_v55, %v1362_v40  ;;  %v1366_v24 = vmul.f32 %v2777_v8, %v1362_v40 }
 0x1a7   :  { %v932_v36 = vadd.f32 %v922_v23, %v892_v31  ;;  %v1390_v31 = vmul.f32 %v2791_v55, %v1388_v54  ;;  %v1429_v23 = vmul.f32 %v2762_v52, %v1428_v56 }
 0x1a8   :  { %v934_v46 = vadd.f32 %v926_v58, %v894_v41  ;;  %v1433_v41 = vmul.f32 %v2777_v8, %v1428_v56 }
 0x1a9   :  { %v1402_v53 = vrot.slane %v1390_v31, 1  ;;  %v1441_v28 = vrot.slane %v1429_v23, 2 }
 0x1ab   :  { %1345 = vrot.lane.b32.xlu1 %v1337_v7, %s2170_s25  ;;  %v1403_v58 = vsel %vm113_vm6, %v1401_v29, %v1402_v53  ;;  %v1405_v16 = vsel %vm113_vm6, %v1402_v53, %v1404_v30  ;;  %v1447_v7 = vrot.slane %v1433_v41, 2  ;;  %v1508_v53 = vstv %s2040_s7 }
 0x1ac   :  { %1349 = vrot.lane.b32.xlu0 %v1342_v1, %s2170_s25  ;;  %1309 = vrot.lane.b32.xlu2 %v1302_v43, %s2170_s25  ;;  %v1446_v43 = vrot.slane %v1432_v11, 2  ;;  %v1510_v29 = vmul.f32 %v2791_v55, %v1508_v53  ;;  %v1514_v41 = vmul.f32 %v2806_v17, %v1508_v53 }
 0x1ad   :  { %v924_v34 = vpop.permute.xlu1 %923 }
 0x1ae   :  { %v933_v33 = vadd.f32 %v924_v34, %v893_v39  ;;  %v960_v26 = vpop.permute.xlu0 %959  ;;  %v1002_v59 = vpop.permute.xlu2 %1001  ;;  %v1394_v39 = vmul.f32 %v2806_v17, %v1388_v54  ;;  %v1443_v34 = vsel %vm146_vm7, %v1441_v28, %v1442_v13  ;;  %v1448_v45 = vsel %vm146_vm7, %v1446_v43, %v1447_v7 }
 0x1af   :  { %v971_v49 = vadd.f32 %v960_v26, %v931_v44  ;;  %v1468_v26 = vstv %s2039_s6  ;;  %v1522_v30 = vrot.slane %v1510_v29, 4 }
 0x1b0   :  { %v973_v0 = vadd.f32 %v964_v48, %v933_v33  ;;  %v1409_v2 = vrot.slane %v1394_v39, 1  ;;  %v1434_v33 = vmul.f32 %v2806_v17, %v1428_v56  ;;  %v1470_v60 = vmul.f32 %v2791_v55, %v1468_v26 }
 0x1b1   :  { %v1469_v4 = vmul.f32 %v2762_v52, %v1468_v26  ;;  %v1474_v23 = vmul.f32 %v2806_v17, %v1468_v26 }
 0x1b2   :  { %v1410_v37 = vsel %vm113_vm6, %v1407_v62, %v1409_v2 }
 0x1b3   :  { %1351 = vrot.lane.b32.xlu1 %v1344_v5, %s2170_s25 }
 0x1b4   :  { %1373 = vrot.lane.b32.xlu0 %v1364_v15, %s2171_s4  ;;  %1347 = vrot.lane.b32.xlu2 %v1339_v63, %s2170_s25  ;;  %v1449_v63 = vrot.slane %v1434_v33, 2 }
 0x1b5   :  { %v962_v35 = vpop.permute.xlu1 %961 }
 0x1b6   :  { %v972_v51 = vadd.f32 %v962_v35, %v932_v36  ;;  %v966_v12 = vpop.permute.xlu0 %965  ;;  %v1040_v57 = vpop.permute.xlu2 %1039  ;;  %v1392_v36 = vmul.f32 %v2756_v14, %v1388_v54  ;;  %v1482_v35 = vrot.slane %v1470_v60, 3  ;;  %v1512_v60 = vmul.f32 %v2756_v14, %v1508_v53 }
 0x1b7   :  { %v974_v21 = vadd.f32 %v966_v12, %v934_v46 }
 0x1b8   :  { %v1012_v32 = vadd.f32 %v1002_v59, %v972_v51  ;;  %v1406_v42 = vrot.slane %v1392_v36, 1  ;;  %v1431_v59 = vmul.f32 %v2773_v18, %v1428_v56 }
 0x1ba   :  { %v1444_v51 = vrot.slane %v1431_v59, 2 }
 0x1bb   :  { %1375 = vrot.lane.b32.xlu1 %v1365_v20, %s2171_s4 }
 0x1bc   :  { %1411 = vrot.lane.b32.xlu0 %v1403_v58, %s2171_s4  ;;  %1371 = vrot.lane.b32.xlu2 %v1363_v38, %s2171_s4  ;;  %v1445_v20 = vsel %vm146_vm7, %v1442_v13, %v1444_v51  ;;  %v1472_v38 = vmul.f32 %v2756_v14, %v1468_v26  ;;  %v1509_v58 = vmul.f32 %v2762_v52, %v1508_v53  ;;  %v1526_v51 = vrot.slane %v1512_v60, 4  ;;  %v3042_v60 = vld [vmem:[#allocation2 + $0x8] sm:$0xff] }
 0x1bd   :  { %v1000_v27 = vpop.permute.xlu1 %999 }
 0x1be   :  { %v1011_v22 = vadd.f32 %v1000_v27, %v971_v49  ;;  %v1004_v25 = vpop.permute.xlu0 %1003  ;;  %v1046_v44 = vpop.permute.xlu2 %1045  ;;  %v1408_v49 = vsel %vm113_vm6, %v1406_v42, %v1407_v62  ;;  %v1521_v2 = vrot.slane %v1509_v58, 4 }
 0x1bf   :  { %v1013_v19 = vadd.f32 %v1004_v25, %v973_v0  ;;  %v1471_v0 = vmul.f32 %v2773_v18, %v1468_v26 }
 0x1c0   :  { %v1051_v6 = vadd.f32 %v1040_v57, %v1011_v22  ;;  %v1450_v57 = vsel %vm146_vm7, %v1447_v7, %v1449_v63  ;;  %v1523_v9 = vsel %vm212_vm9, %v1521_v2, %v1522_v30  ;;  %v1489_v7 = vrot.slane %v1474_v23, 3  ;;  %v3025_v2 = vld [vmem:[#allocation2 + $0x18] sm:$0xff] }
 0x1c1   :  { %v1484_v61 = vrot.slane %v1471_v0, 3 }
 0x1c3   :  { %1413 = vrot.lane.b32.xlu1 %v1405_v16, %s2171_s4  ;;  %v1511_v16 = vmul.f32 %v2773_v18, %v1508_v53 }
 0x1c4   :  { %1417 = vrot.lane.b32.xlu0 %v1410_v37, %s2171_s4  ;;  %1377 = vrot.lane.b32.xlu2 %v1366_v24, %s2171_s4  ;;  %v1513_v24 = vmul.f32 %v2777_v8, %v1508_v53 }
 0x1c5   :  { %v1006_v48 = vpop.permute.xlu1 %1005 }
 0x1c6   :  { %v1014_v47 = vadd.f32 %v1006_v48, %v974_v21  ;;  %v1042_v50 = vpop.permute.xlu0 %1041  ;;  %v1084_v46 = vpop.permute.xlu2 %1083  ;;  %v1473_v21 = vmul.f32 %v2777_v8, %v1468_v26  ;;  %v1527_v13 = vrot.slane %v1513_v24, 4 }
 0x1c7   :  { %v1052_v3 = vadd.f32 %v1042_v50, %v1012_v32  ;;  %v1485_v32 = vsel %vm179_vm8, %v1482_v35, %v1484_v61  ;;  %v1524_v50 = vrot.slane %v1511_v16, 4  ;;  %v3028_v16 = vld [vmem:[#allocation2] sm:$0xff] }
 0x1c8   :  { %v1054_v1 = vadd.f32 %v1046_v44, %v1014_v47  ;;  %v1487_v25 = vrot.slane %v1473_v21, 3  ;;  %v1528_v53 = vsel %vm212_vm9, %v1526_v51, %v1527_v13 }
 0x1c9   :  { %v1525_v43 = vsel %vm212_vm9, %v1522_v30, %v1524_v50 }
 0x1ca   :  { %v1490_v33 = vsel %vm179_vm8, %v1487_v25, %v1489_v7 }
 0x1cb   :  { %1451 = vrot.lane.b32.xlu1 %v1443_v34, %s2171_s4 }
 0x1cc   :  { %1455 = vrot.lane.b32.xlu0 %v1448_v45, %s2171_s4  ;;  %1415 = vrot.lane.b32.xlu2 %v1408_v49, %s2171_s4 }
 0x1cd   :  { %v1044_v40 = vpop.permute.xlu1 %1043 }
 0x1ce   :  { %v1053_v5 = vadd.f32 %v1044_v40, %v1013_v19  ;;  %v1080_v15 = vpop.permute.xlu0 %1079  ;;  %v1108_v54 = vpop.permute.xlu2 %1107  ;;  %v1486_v19 = vrot.slane %v1472_v38, 3 }
 0x1cf   :  { %v1091_v31 = vadd.f32 %v1080_v15, %v1051_v6  ;;  %v1481_v6 = vrot.slane %v1469_v4, 3 }
 0x1d0   :  { %v1093_v12 = vadd.f32 %v1084_v46, %v1053_v5  ;;  %v1488_v56 = vsel %vm179_vm8, %v1486_v19, %v1487_v25 }
 0x1d1   :  { %v1483_v37 = vsel %vm179_vm8, %v1481_v6, %v1482_v35 }
 0x1d3   :  { %1457 = vrot.lane.b32.xlu1 %v1450_v57, %s2171_s4 }
 0x1d4   :  { %1493 = vrot.lane.b32.xlu0 %v1485_v32, %s2171_s4  ;;  %1453 = vrot.lane.b32.xlu2 %v1445_v20, %s2171_s4 }
 0x1d5   :  { %v1082_v10 = vpop.permute.xlu1 %1081 }
 0x1d6   :  { %v1092_v39 = vadd.f32 %v1082_v10, %v1052_v3  ;;  %v1086_v27 = vpop.permute.xlu0 %1085  ;;  %v1146_v22 = vpop.permute.xlu2 %1145  ;;  %v1529_v3 = vrot.slane %v1514_v41, 4 }
 0x1d7   :  { %v1094_v44 = vadd.f32 %v1086_v27, %v1054_v1  ;;  %v1548_v1 = vstv %s2041_s8 }
 0x1d8   :  { %v1118_v62 = vadd.f32 %v1108_v54, %v1092_v39  ;;  %v1550_v42 = vmul.f32 %v2791_v55, %v1548_v1  ;;  %v1530_v34 = vsel %vm212_vm9, %v1527_v13, %v1529_v3  ;;  %v1553_v26 = vmul.f32 %v2777_v8, %v1548_v1 }
 0x1d9   :  { %v1549_v59 = vmul.f32 %v2762_v52, %v1548_v1  ;;  %v1552_v49 = vmul.f32 %v2756_v14, %v1548_v1  ;;  %v1554_v52 = vmul.f32 %v2806_v17, %v1548_v1  ;;  %v1551_v20 = vmul.f32 %v2773_v18, %v1548_v1 }
 0x1da   :  { %v1562_v15 = vrot.slane %v1550_v42, 5  ;;  %v1567_v63 = vrot.slane %v1553_v26, 5 }
 0x1db   :  { %1495 = vrot.lane.b32.xlu1 %v1488_v56, %s2171_s4  ;;  %v1566_v61 = vrot.slane %v1552_v49, 5  ;;  %v1569_v4 = vrot.slane %v1554_v52, 5  ;;  %v1564_v25 = vrot.slane %v1551_v20, 5  ;;  %v1694_v20 = vstv %s2045_s13 }
 0x1dc   :  { %1531 = vrot.lane.b32.xlu0 %v1523_v9, %s2171_s4  ;;  %1491 = vrot.lane.b32.xlu2 %v1483_v37, %s2171_s4 }
 0x1dd   :  { %v1106_v48 = vpop.permute.xlu1 %1105  ;;  %v1568_v14 = vsel %vm245_vm10, %v1566_v61, %v1567_v63  ;;  %v1570_v30 = vsel %vm245_vm10, %v1567_v63, %v1569_v4 }
 0x1de   :  { %v1117_v11 = vadd.f32 %v1106_v48, %v1091_v31  ;;  %v1110_v36 = vpop.permute.xlu0 %1109  ;;  %v1152_v47 = vpop.permute.xlu2 %1151  ;;  %v1561_v31 = vrot.slane %v1549_v59, 5  ;;  %v1628_v48 = vstv %s2043_s10  ;;  %v1654_v59 = vstv %s2044_s11 }
 0x1df   :  { %v1119_v46 = vadd.f32 %v1110_v36, %v1093_v12  ;;  %v1588_v12 = vstv %s2042_s9  ;;  %v1630_v26 = vmul.f32 %v2791_v55, %v1628_v48 }
 0x1e0   :  { %v1157_v28 = vadd.f32 %v1146_v22, %v1117_v11  ;;  %v1563_v57 = vsel %vm245_vm10, %v1561_v31, %v1562_v15  ;;  %v1590_v21 = vmul.f32 %v2791_v55, %v1588_v12  ;;  %v1591_v32 = vmul.f32 %v2773_v18, %v1588_v12 }
 0x1e1   :  { %v1593_v19 = vmul.f32 %v2777_v8, %v1588_v12  ;;  %v1592_v6 = vmul.f32 %v3025_v2, %v1588_v12  ;;  %v1589_v24 = vmul.f32 %v3028_v16, %v1588_v12  ;;  %v1594_v3 = vmul.f32 %v2806_v17, %v1588_v12 }
 0x1e2   :  { %v1602_v27 = vrot.slane %v1590_v21, 6  ;;  %v1604_v22 = vrot.slane %v1591_v32, 6  ;;  %v1655_v55 = vmul.f32 %v3028_v16, %v1654_v59  ;;  %v1660_v32 = vmul.f32 %v2806_v17, %v1654_v59 }
 0x1e3   :  { %1533 = vrot.lane.b32.xlu1 %v1525_v43, %s2171_s4  ;;  %v1607_v41 = vrot.slane %v1593_v19, 6  ;;  %v1606_v11 = vrot.slane %v1592_v6, 6 }
 0x1e4   :  { %1537 = vrot.lane.b32.xlu0 %v1530_v34, %s2171_s4  ;;  %1497 = vrot.lane.b32.xlu2 %v1490_v33, %s2171_s4  ;;  %v1605_v18 = vsel %vm278_vm11, %v1602_v27, %v1604_v22  ;;  %v1609_v34 = vrot.slane %v1594_v3, 6 }
 0x1e5   :  { %v1112_v45 = vpop.permute.xlu1 %1111  ;;  %v1608_v50 = vsel %vm278_vm11, %v1606_v11, %v1607_v41  ;;  %v1695_v11 = vmul.f32 %v3028_v16, %v1694_v20 }
 0x1e6   :  { %v1120_v0 = vadd.f32 %v1112_v45, %v1094_v44  ;;  %v1148_v40 = vpop.permute.xlu0 %1147  ;;  %v1190_v5 = vpop.permute.xlu2 %1189  ;;  %v3039_v45 = vld [vmem:[#allocation2 + $0x20] sm:$0xff] }
 0x1e7   :  { %v1158_v54 = vadd.f32 %v1148_v40, %v1118_v62  ;;  %v1565_v62 = vsel %vm245_vm10, %v1562_v15, %v1564_v25  ;;  %v1632_v49 = vmul.f32 %v3039_v45, %v1628_v48  ;;  %v1610_v40 = vsel %vm278_vm11, %v1607_v41, %v1609_v34 }
 0x1e8   :  { %v1160_v35 = vadd.f32 %v1152_v47, %v1120_v0  ;;  %v1601_v47 = vrot.slane %v1589_v24, 6  ;;  %v1656_v0 = vmul.f32 %v3042_v60, %v1654_v59  ;;  %v1675_v25 = vrot.slane %v1660_v32, 1 }
 0x1e9   :  { %v1734_v24 = vstv %s2046_s14  ;;  %v1698_v41 = vmul.f32 %v3025_v2, %v1694_v20 }
 0x1ea   :  { %v1603_v13 = vsel %vm278_vm11, %v1601_v47, %v1602_v27  ;;  %v1668_v61 = vrot.slane %v1656_v0, 1 }
 0x1eb   :  { %1571 = vrot.lane.b32.xlu1 %v1563_v57, %s2171_s4  ;;  %v1667_v57 = vrot.slane %v1655_v55, 1 }
 0x1ec   :  { %1575 = vrot.lane.b32.xlu0 %v1568_v14, %s2171_s4  ;;  %1535 = vrot.lane.b32.xlu2 %v1528_v53, %s2171_s4  ;;  %v1631_v53 = vmul.f32 %v3025_v2, %v1628_v48 }
 0x1ed   :  { %v1150_v29 = vpop.permute.xlu1 %1149  ;;  %v1669_v14 = vsel %vm113_vm6, %v1667_v57, %v1668_v61  ;;  %v1774_v57 = vstv %s2047_s15 }
 0x1ee   :  { %v1159_v38 = vadd.f32 %v1150_v29, %v1119_v46  ;;  %v1186_v10 = vpop.permute.xlu0 %1185  ;;  %v1228_v58 = vpop.permute.xlu2 %1227  ;;  %v1629_v46 = vmul.f32 %v3028_v16, %v1628_v48  ;;  %v1735_v48 = vmul.f32 %v3028_v16, %v1734_v24  ;;  %v1779_v32 = vmul.f32 %v3039_v45, %v1774_v57 }
 0x1ef   :  { %v1197_v39 = vadd.f32 %v1186_v10, %v1157_v28  ;;  %v3058_v10 = vld [vmem:[#allocation2 + $0x10] sm:$0x3f] }
 0x1f0   :  { %v1199_v44 = vadd.f32 %v1190_v5, %v1159_v38  ;;  %v1659_v5 = vmul.f32 %v3039_v45, %v1654_v59  ;;  %v1696_v38 = vmul.f32 %v3042_v60, %v1694_v20  ;;  %v1657_v4 = vmul.f32 %v3058_v10, %v1654_v59 }
 0x1f1   :  { %v1737_v34 = vmul.f32 %v3058_v10, %v1734_v24 }
 0x1f2   :  { %v1673_v12 = vrot.slane %v1659_v5, 1 }
 0x1f3   :  { %1577 = vrot.lane.b32.xlu1 %v1570_v30, %s2171_s4  ;;  %v1708_v30 = vrot.slane %v1696_v38, 2 }
 0x1f4   :  { %1613 = vrot.lane.b32.xlu0 %v1605_v18, %s2171_s4  ;;  %1573 = vrot.lane.b32.xlu2 %v1565_v62, %s2171_s4  ;;  %v1670_v18 = vrot.slane %v1657_v4, 1  ;;  %v1676_v6 = vsel %vm113_vm6, %v1673_v12, %v1675_v25  ;;  %v1793_v25 = vrot.slane %v1779_v32, 4 }
 0x1f5   :  { %v1188_v56 = vpop.permute.xlu1 %1187 }
 0x1f6   :  { %v1198_v8 = vadd.f32 %v1188_v56, %v1158_v54  ;;  %v1192_v9 = vpop.permute.xlu0 %1191  ;;  %v1266_v37 = vpop.permute.xlu2 %1265  ;;  %v1658_v54 = vmul.f32 %v3025_v2, %v1654_v59  ;;  %v1699_v56 = vmul.f32 %v3039_v45, %v1694_v20 }
 0x1f7   :  { %v1200_v23 = vadd.f32 %v1192_v9, %v1160_v35  ;;  %v1671_v9 = vsel %vm113_vm6, %v1668_v61, %v1670_v18 }
 0x1f8   :  { %v1238_v36 = vadd.f32 %v1228_v58, %v1198_v8  ;;  %v1672_v21 = vrot.slane %v1658_v54, 1  ;;  %v1697_v58 = vmul.f32 %v3058_v10, %v1694_v20 }
 0x1fa   :  { %v1674_v29 = vsel %vm113_vm6, %v1672_v21, %v1673_v12  ;;  %v1710_v19 = vrot.slane %v1697_v58, 2  ;;  %v1776_v21 = vmul.f32 %v3042_v60, %v1774_v57  ;;  %v1778_v58 = vmul.f32 %v3025_v2, %v1774_v57 }
 0x1fb   :  { %1615 = vrot.lane.b32.xlu1 %v1608_v50, %s2171_s4 }
 0x1fc   :  { %1637 = vrot.lane.b32.xlu0 %v1629_v46, %s2172_s12  ;;  %1611 = vrot.lane.b32.xlu2 %v1603_v13, %s2171_s4  ;;  %v1711_v8 = vsel %vm146_vm7, %v1708_v30, %v1710_v19  ;;  %v1713_v46 = vrot.slane %v1699_v56, 2  ;;  %v1792_v18 = vrot.slane %v1778_v58, 4 }
 0x1fd   :  { %v1226_v7 = vpop.permute.xlu1 %1225 }
 0x1fe   :  { %v1237_v28 = vadd.f32 %v1226_v7, %v1197_v39  ;;  %v1230_v1 = vpop.permute.xlu0 %1229  ;;  %v1272_v43 = vpop.permute.xlu2 %1271  ;;  %v1712_v7 = vrot.slane %v1698_v41, 2  ;;  %v1777_v41 = vmul.f32 %v3058_v10, %v1774_v57 }
 0x1ff   :  { %v1239_v42 = vadd.f32 %v1230_v1, %v1199_v44  ;;  %v1747_v1 = vrot.slane %v1735_v48, 3 }
 0x200   :  { %v1277_v33 = vadd.f32 %v1266_v37, %v1237_v28  ;;  %v1736_v37 = vmul.f32 %v3042_v60, %v1734_v24 }
 0x202   :  { %v1748_v3 = vrot.slane %v1736_v37, 3 }
 0x203   :  { %1639 = vrot.lane.b32.xlu1 %v1630_v26, %s2172_s12 }
 0x204   :  { %1643 = vrot.lane.b32.xlu0 %v1632_v49, %s2172_s12  ;;  %1617 = vrot.lane.b32.xlu2 %v1610_v40, %s2171_s4  ;;  %v1749_v26 = vsel %vm179_vm8, %v1747_v1, %v1748_v3  ;;  %v3081_v49 = vld [vmem:[#allocation2 + $0x28] sm:$0x3f] }
 0x205   :  { %v1232_v15 = vpop.permute.xlu1 %1231  ;;  %v1740_v0 = vmul.f32 %v3081_v49, %v1734_v24  ;;  %v1700_v40 = vmul.f32 %v3081_v49, %v1694_v20  ;;  %v1775_v20 = vmul.f32 %v3028_v16, %v1774_v57  ;;  %v1780_v56 = vmul.f32 %v3081_v49, %v1774_v57 }
 0x206   :  { %v1240_v63 = vadd.f32 %v1232_v15, %v1200_v23  ;;  %v1268_v31 = vpop.permute.xlu0 %1267  ;;  %v1310_v35 = vpop.permute.xlu2 %1309 }
 0x207   :  { %v1278_v51 = vadd.f32 %v1268_v31, %v1238_v36  ;;  %v1755_v61 = vrot.slane %v1740_v0, 3 }
 0x208   :  { %v1280_v52 = vadd.f32 %v1272_v43, %v1240_v63  ;;  %v1707_v43 = vrot.slane %v1695_v11, 2  ;;  %v1750_v63 = vrot.slane %v1737_v34, 3 }
 0x20a   :  { %v1709_v59 = vsel %vm146_vm7, %v1707_v43, %v1708_v30  ;;  %v1854_v43 = vstv %s2049_s17 }
 0x20b   :  { %1677 = vrot.lane.b32.xlu1 %v1669_v14, %s2172_s12  ;;  %v1855_v0 = vmul.f32 %v3028_v16, %v1854_v43  ;;  %v1857_v57 = vmul.f32 %v3058_v10, %v1854_v43 }
 0x20c   :  { %1681 = vrot.lane.b32.xlu0 %v1674_v29, %s2172_s12  ;;  %1641 = vrot.lane.b32.xlu2 %v1631_v53, %s2172_s12  ;;  %v1738_v29 = vmul.f32 %v3025_v2, %v1734_v24 }
 0x20d   :  { %v1270_v39 = vpop.permute.xlu1 %1269 }
 0x20e   :  { %v1279_v17 = vadd.f32 %v1270_v39, %v1239_v42  ;;  %v1306_v27 = vpop.permute.xlu0 %1305  ;;  %v1348_v22 = vpop.permute.xlu2 %1347  ;;  %v1714_v42 = vsel %vm146_vm7, %v1712_v7, %v1713_v46  ;;  %v1752_v30 = vrot.slane %v1738_v29, 3 }
 0x20f   :  { %v1317_v44 = vadd.f32 %v1306_v27, %v1277_v33  ;;  %v1739_v33 = vmul.f32 %v3039_v45, %v1734_v24  ;;  %v1788_v27 = vrot.slane %v1776_v21, 4  ;;  %v1814_v24 = vstv %s2048_s16 }
 0x210   :  { %v1319_v62 = vadd.f32 %v1310_v35, %v1279_v17  ;;  %v1817_v37 = vmul.f32 %v3058_v10, %v1814_v24  ;;  %v1819_v1 = vmul.f32 %v3039_v45, %v1814_v24 }
 0x211   :  { %v1753_v35 = vrot.slane %v1739_v33, 3  ;;  %v1856_v33 = vmul.f32 %v3042_v60, %v1854_v43 }
 0x213   :  { %1683 = vrot.lane.b32.xlu1 %v1676_v6, %s2172_s12  ;;  %v1756_v14 = vsel %vm179_vm8, %v1753_v35, %v1755_v61  ;;  %v1754_v6 = vsel %vm179_vm8, %v1752_v30, %v1753_v35 }
 0x214   :  { %1719 = vrot.lane.b32.xlu0 %v1711_v8, %s2172_s12  ;;  %1679 = vrot.lane.b32.xlu2 %v1671_v9, %s2172_s12  ;;  %v1794_v8 = vsel %vm212_vm9, %v1792_v18, %v1793_v25  ;;  %v1816_v9 = vmul.f32 %v3042_v60, %v1814_v24  ;;  %v1867_v60 = vrot.slane %v1855_v0, 6 }
 0x215   :  { %v1308_v23 = vpop.permute.xlu1 %1307 }
 0x216   :  { %v1318_v36 = vadd.f32 %v1308_v23, %v1278_v51  ;;  %v1312_v47 = vpop.permute.xlu0 %1311  ;;  %v1372_v50 = vpop.permute.xlu2 %1371  ;;  %v1715_v51 = vrot.slane %v1700_v40, 2  ;;  %v1815_v40 = vmul.f32 %v3028_v16, %v1814_v24 }
 0x217   :  { %v1320_v13 = vadd.f32 %v1312_v47, %v1280_v52  ;;  %v1751_v52 = vsel %vm179_vm8, %v1748_v3, %v1750_v63  ;;  %v1795_v47 = vrot.slane %v1780_v56, 4  ;;  %v1790_v3 = vrot.slane %v1777_v41, 4 }
 0x218   :  { %v1358_v28 = vadd.f32 %v1348_v22, %v1318_v36  ;;  %v1716_v53 = vsel %vm146_vm7, %v1713_v46, %v1715_v51  ;;  %v1828_v46 = vrot.slane %v1816_v9, 5  ;;  %v1827_v51 = vrot.slane %v1815_v40, 5 }
 0x219   :  { %v1791_v34 = vsel %vm212_vm9, %v1788_v27, %v1790_v3 }
 0x21a   :  { %v1829_v21 = vsel %vm245_vm10, %v1827_v51, %v1828_v46 }
 0x21b   :  { %1721 = vrot.lane.b32.xlu1 %v1714_v42, %s2172_s12 }
 0x21c   :  { %1757 = vrot.lane.b32.xlu0 %v1749_v26, %s2172_s12  ;;  %1717 = vrot.lane.b32.xlu2 %v1709_v59, %s2172_s12  ;;  %v1818_v26 = vmul.f32 %v3025_v2, %v1814_v24 }
 0x21d   :  { %v1346_v5 = vpop.permute.xlu1 %1345 }
 0x21e   :  { %v1357_v55 = vadd.f32 %v1346_v5, %v1317_v44  ;;  %v1350_v15 = vpop.permute.xlu0 %1349  ;;  %v1378_v54 = vpop.permute.xlu2 %1377  ;;  %v1787_v44 = vrot.slane %v1775_v20, 4  ;;  %v1832_v35 = vrot.slane %v1818_v26, 5 }
 0x21f   :  { %v1359_v31 = vadd.f32 %v1350_v15, %v1319_v62 }
 0x220   :  { %v1383_v12 = vadd.f32 %v1372_v50, %v1357_v55  ;;  %v1789_v62 = vsel %vm212_vm9, %v1787_v44, %v1788_v27  ;;  %v1858_v44 = vmul.f32 %v3025_v2, %v1854_v43 }
 0x222   :  { %v1872_v56 = vrot.slane %v1858_v44, 6 }
 0x223   :  { %1759 = vrot.lane.b32.xlu1 %v1751_v52, %s2172_s12  ;;  %v1859_v52 = vmul.f32 %v3039_v45, %v1854_v43 }
 0x224   :  { %1763 = vrot.lane.b32.xlu0 %v1756_v14, %s2172_s12  ;;  %1723 = vrot.lane.b32.xlu2 %v1716_v53, %s2172_s12  ;;  %v1860_v14 = vmul.f32 %v3081_v49, %v1854_v43  ;;  %v1820_v53 = vmul.f32 %v3081_v49, %v1814_v24 }
 0x225   :  { %v1352_v38 = vpop.permute.xlu1 %1351  ;;  %v1873_v58 = vrot.slane %v1859_v52, 6 }
 0x226   :  { %v1360_v4 = vadd.f32 %v1352_v38, %v1320_v13  ;;  %v1374_v39 = vpop.permute.xlu0 %1373  ;;  %v1416_v17 = vpop.permute.xlu2 %1415  ;;  %v1830_v13 = vrot.slane %v1817_v37, 5  ;;  %v1870_v38 = vrot.slane %v1857_v57, 6 }
 0x227   :  { %v1384_v22 = vadd.f32 %v1374_v39, %v1358_v28  ;;  %v1796_v28 = vsel %vm212_vm9, %v1793_v25, %v1795_v47  ;;  %v1835_v39 = vrot.slane %v1820_v53, 5  ;;  %v1874_v24 = vsel %vm278_vm11, %v1872_v56, %v1873_v58 }
 0x228   :  { %v1386_v19 = vadd.f32 %v1378_v54, %v1360_v4  ;;  %v1831_v42 = vsel %vm245_vm10, %v1828_v46, %v1830_v13  ;;  %v1833_v54 = vrot.slane %v1819_v1, 5  ;;  %v1875_v4 = vrot.slane %v1860_v14, 6 }
 0x22a   :  { %v1876_v49 = vsel %vm278_vm11, %v1873_v58, %v1875_v4 }
 0x22b   :  { %1797 = vrot.lane.b32.xlu1 %v1789_v62, %s2172_s12 }
 0x22c   :  { %1801 = vrot.lane.b32.xlu0 %v1794_v8, %s2172_s12  ;;  %1761 = vrot.lane.b32.xlu2 %v1754_v6, %s2172_s12 }
 0x22d   :  { %v1376_v23 = vpop.permute.xlu1 %1375 }
 0x22e   :  { %v1385_v48 = vadd.f32 %v1376_v23, %v1359_v31  ;;  %v1412_v11 = vpop.permute.xlu0 %1411  ;;  %v1454_v36 = vpop.permute.xlu2 %1453  ;;  %v1868_v31 = vrot.slane %v1856_v33, 6 }
 0x22f   :  { %v1423_v50 = vadd.f32 %v1412_v11, %v1383_v12  ;;  %v1834_v12 = vsel %vm245_vm10, %v1832_v35, %v1833_v54 }
 0x230   :  { %v1425_v7 = vadd.f32 %v1416_v17, %v1385_v48  ;;  %v1869_v16 = vsel %vm278_vm11, %v1867_v60, %v1868_v31  ;;  %v1871_v27 = vsel %vm278_vm11, %v1868_v31, %v1870_v38 }
 0x233   :  { %1803 = vrot.lane.b32.xlu1 %v1796_v28, %s2172_s12 }
 0x234   :  { %1839 = vrot.lane.b32.xlu0 %v1831_v42, %s2172_s12  ;;  %1799 = vrot.lane.b32.xlu2 %v1791_v34, %s2172_s12 }
 0x235   :  { %v1414_v59 = vpop.permute.xlu1 %1413 }
 0x236   :  { %v1424_v5 = vadd.f32 %v1414_v59, %v1384_v22  ;;  %v1418_v55 = vpop.permute.xlu0 %1417  ;;  %v1492_v15 = vpop.permute.xlu2 %1491  ;;  %v1836_v22 = vsel %vm245_vm10, %v1833_v54, %v1835_v39 }
 0x237   :  { %v1426_v63 = vadd.f32 %v1418_v55, %v1386_v19 }
 0x238   :  { %v1464_v61 = vadd.f32 %v1454_v36, %v1424_v5 }
 0x23b   :  { %1841 = vrot.lane.b32.xlu1 %v1834_v12, %s2172_s12 }
 0x23c   :  { %1877 = vrot.lane.b32.xlu0 %v1869_v16, %s2172_s12  ;;  %1837 = vrot.lane.b32.xlu2 %v1829_v21, %s2172_s12 }
 0x23d   :  { %v1452_v32 = vpop.permute.xlu1 %1451 }
 0x23e   :  { %v1463_v20 = vadd.f32 %v1452_v32, %v1423_v50  ;;  %v1456_v29 = vpop.permute.xlu0 %1455  ;;  %v1498_v10 = vpop.permute.xlu2 %1497 }
 0x23f   :  { %v1465_v45 = vadd.f32 %v1456_v29, %v1425_v7 }
 0x240   :  { %v1503_v17 = vadd.f32 %v1492_v15, %v1463_v20 }
 0x243   :  { %1879 = vrot.lane.b32.xlu1 %v1871_v27, %s2172_s12 }
 0x244   :  { %1883 = vrot.lane.b32.xlu0 %v1876_v49, %s2172_s12  ;;  %1843 = vrot.lane.b32.xlu2 %v1836_v22, %s2172_s12 }
 0x245   :  { %v1458_v25 = vpop.permute.xlu1 %1457 }
 0x246   :  { %v1466_v30 = vadd.f32 %v1458_v25, %v1426_v63  ;;  %v1494_v19 = vpop.permute.xlu0 %1493  ;;  %v1536_v18 = vpop.permute.xlu2 %1535 }
 0x247   :  { %v1504_v62 = vadd.f32 %v1494_v19, %v1464_v61 }
 0x248   :  { %v1506_v6 = vadd.f32 %v1498_v10, %v1466_v30 }
 0x24c   :  { %1881 = vrot.lane.b32.xlu2 %v1874_v24, %s2172_s12 }
 0x24d   :  { %v1496_v8 = vpop.permute.xlu1 %1495 }
 0x24e   :  { %v1505_v9 = vadd.f32 %v1496_v8, %v1465_v45  ;;  %v1532_v37 = vpop.permute.xlu0 %1531  ;;  %v1574_v41 = vpop.permute.xlu2 %1573 }
 0x24f   :  { %v1543_v23 = vadd.f32 %v1532_v37, %v1503_v17 }
 0x250   :  { %v1545_v48 = vadd.f32 %v1536_v18, %v1505_v9 }
 0x255   :  { %v1534_v11 = vpop.permute.xlu1 %1533 }
 0x256   :  { %v1544_v36 = vadd.f32 %v1534_v11, %v1504_v62  ;;  %v1538_v47 = vpop.permute.xlu0 %1537  ;;  %v1612_v2 = vpop.permute.xlu2 %1611 }
 0x257   :  { %v1546_v50 = vadd.f32 %v1538_v47, %v1506_v6 }
 0x258   :  { %v1584_v46 = vadd.f32 %v1574_v41, %v1544_v36 }
 0x25d   :  { %v1572_v13 = vpop.permute.xlu1 %1571 }
 0x25e   :  { %v1583_v3 = vadd.f32 %v1572_v13, %v1543_v23  ;;  %v1576_v7 = vpop.permute.xlu0 %1575  ;;  %v1618_v28 = vpop.permute.xlu2 %1617 }
 0x25f   :  { %v1585_v1 = vadd.f32 %v1576_v7, %v1545_v48 }
 0x260   :  { %v1623_v43 = vadd.f32 %v1612_v2, %v1583_v3 }
 0x265   :  { %v1578_v42 = vpop.permute.xlu1 %1577 }
 0x266   :  { %v1586_v34 = vadd.f32 %v1578_v42, %v1546_v50  ;;  %v1614_v33 = vpop.permute.xlu0 %1613  ;;  %v1642_v26 = vpop.permute.xlu2 %1641 }
 0x267   :  { %v1624_v59 = vadd.f32 %v1614_v33, %v1584_v46 }
 0x268   :  { %v1626_v0 = vadd.f32 %v1618_v28, %v1586_v34 }
 0x26d   :  { %v1616_v40 = vpop.permute.xlu1 %1615 }
 0x26e   :  { %v1638_v5 = vpop.permute.xlu0 %1637  ;;  %v1680_v55 = vpop.permute.xlu2 %1679  ;;  %v1625_v20 = vadd.f32 %v1616_v40, %v1585_v1 }
 0x26f   :  { %v1649_v10 = vadd.f32 %v1638_v5, %v1623_v43 }
 0x270   :  { %v1651_v45 = vadd.f32 %v1642_v26, %v1625_v20 }
 0x275   :  { %v1640_v15 = vpop.permute.xlu1 %1639 }
 0x276   :  { %v1644_v54 = vpop.permute.xlu0 %1643  ;;  %v1718_v63 = vpop.permute.xlu2 %1717  ;;  %v1650_v27 = vadd.f32 %v1640_v15, %v1624_v59 }
 0x277   :  { %v1652_v25 = vadd.f32 %v1644_v54, %v1626_v0 }
 0x278   :  { %v1690_v18 = vadd.f32 %v1680_v55, %v1650_v27 }
 0x27d   :  { %v1678_v31 = vpop.permute.xlu1 %1677 }
 0x27e   :  { %v1682_v35 = vpop.permute.xlu0 %1681  ;;  %v1724_v61 = vpop.permute.xlu2 %1723  ;;  %v1689_v38 = vadd.f32 %v1678_v31, %v1649_v10 }
 0x27f   :  { %v1691_v58 = vadd.f32 %v1682_v35, %v1651_v45  ;;  %v1969_v45 = vld [vmem:[#allocation7] sm:$0xff] }
 0x280   :  { %v1729_v4 = vadd.f32 %v1718_v63, %v1689_v38 }
 0x285   :  { %v1684_v60 = vpop.permute.xlu1 %1683 }
 0x286   :  { %v1720_v51 = vpop.permute.xlu0 %1719  ;;  %v1762_v12 = vpop.permute.xlu2 %1761  ;;  %v1692_v30 = vadd.f32 %v1684_v60, %v1652_v25 }
 0x287   :  { %v1730_v6 = vadd.f32 %v1720_v51, %v1690_v18 }
 0x288   :  { %v1732_v24 = vadd.f32 %v1724_v61, %v1692_v30 }
 0x28d   :  { %v1722_v57 = vpop.permute.xlu1 %1721 }
 0x28e   :  { %v1758_v52 = vpop.permute.xlu0 %1757  ;;  %v1800_v16 = vpop.permute.xlu2 %1799  ;;  %v1731_v49 = vadd.f32 %v1722_v57, %v1691_v58 }
 0x28f   :  { %v1769_v44 = vadd.f32 %v1758_v52, %v1729_v4 }
 0x290   :  { %v1771_v62 = vadd.f32 %v1762_v12, %v1731_v49 }
 0x295   :  { %v1760_v21 = vpop.permute.xlu1 %1759 }
 0x296   :  { %v1764_v14 = vpop.permute.xlu0 %1763  ;;  %v1838_v53 = vpop.permute.xlu2 %1837  ;;  %v1770_v37 = vadd.f32 %v1760_v21, %v1730_v6 }
 0x297   :  { %v1772_v48 = vadd.f32 %v1764_v14, %v1732_v24 }
 0x298   :  { %v1810_v46 = vadd.f32 %v1800_v16, %v1770_v37 }
 0x29d   :  { %v1798_v32 = vpop.permute.xlu1 %1797 }
 0x29e   :  { %v1802_v29 = vpop.permute.xlu0 %1801  ;;  %v1844_v39 = vpop.permute.xlu2 %1843  ;;  %v1809_v19 = vadd.f32 %v1798_v32, %v1769_v44 }
 0x29f   :  { %v1811_v56 = vadd.f32 %v1802_v29, %v1771_v62 }
 0x2a0   :  { %v1849_v9 = vadd.f32 %v1838_v53, %v1809_v19 }
 0x2a5   :  { %v1804_v17 = vpop.permute.xlu1 %1803 }
 0x2a6   :  { %v1840_v22 = vpop.permute.xlu0 %1839  ;;  %v1882_v11 = vpop.permute.xlu2 %1881  ;;  %v1812_v2 = vadd.f32 %v1804_v17, %v1772_v48  ;;  %v1971_v17 = vld [vmem:[#allocation7 + $0x10] sm:$0xff] }
 0x2a7   :  { %v1850_v3 = vadd.f32 %v1840_v22, %v1810_v46 }
 0x2a8   :  { %v1852_v28 = vadd.f32 %v1844_v39, %v1812_v2 }
 0x2ad   :  { %v1842_v8 = vpop.permute.xlu1 %1841 }
 0x2ae   :  { %v1851_v41 = vadd.f32 %v1842_v8, %v1811_v56  ;;  %v1878_v23 = vpop.permute.xlu0 %1877 }
 0x2af   :  { %v1889_v36 = vadd.f32 %v1878_v23, %v1849_v9  ;;  %v1970_v23 = vld [vmem:[#allocation7 + $0x8] sm:$0xff] }
 0x2b0   :  { %v1891_v47 = vadd.f32 %v1882_v11, %v1851_v41 }
 0x2b1   :  { %v2050_v50 = vmul.f32 -1.442695, %v1889_v36  ;;  %v1972_v36 = vld [vmem:[#allocation7 + $0x18] sm:$0xff] }
 0x2b2   :  { %v2052_v13 = vmul.f32 -1.442695, %v1891_v47 }
 0x2b3   :  { %2067 = vpow2.f32 %v2050_v50 }
 0x2b4   :  { %2069 = vpow2.f32 %v2052_v13 }
 0x2b5   :  { %v1880_v7 = vpop.permute.xlu1 %1879 }
 0x2b6   :  { %v1890_v1 = vadd.f32 %v1880_v7, %v1850_v3  ;;  %v1884_v43 = vpop.permute.xlu0 %1883 }
 0x2b7   :  { %v1892_v42 = vadd.f32 %v1884_v43, %v1852_v28 }
 0x2b8   :  { %v2051_v34 = vmul.f32 -1.442695, %v1890_v1 }
 0x2b9   :  { %v2068_v33 = vpop.eup %2067  ;;  %v2053_v26 = vmul.f32 -1.442695, %v1892_v42 }
 0x2ba   :  { %v2070_v59 = vpop.eup %2069  ;;  %v1905_v0 = vadd.f32 1.0, %v2068_v33  ;;  %2071 = vpow2.f32 %v2051_v34 }
 0x2bb   :  { %v1907_v40 = vadd.f32 1.0, %v2070_v59  ;;  %2073 = vpow2.f32 %v2053_v26 }
 0x2bc   :  { %2075 = vrcp.f32 %v1905_v0  ;;  %v1920_v12 = vand.u32 2147483648, %v1905_v0  ;;  %v1918_v57 = vand.u32 2147483647, %v1905_v0  ;;  %vm1914_vm14 = vweird.f32 %v1905_v0 }
 0x2bd   :  { %2077 = vrcp.f32 %v1907_v40  ;;  %v1948_v16 = vand.u32 2147483647, %v1907_v40  ;;  %v1950_v21 = vand.u32 2147483648, %v1907_v40  ;;  %vm1944_vm15 = vweird.f32 %v1907_v40 }
 0x2be   :  { %vm1919_vm2 = vcmp.eq.f32.partialorder %v1918_v57, 8.507059e+37  ;;  %v1921_v10 = vor.u32 1.1754944e-38, %v1920_v12 }
 0x2bf   :  { %vm1949_vm4 = vcmp.eq.f32.partialorder %v1948_v16, 8.507059e+37  ;;  %v1951_v39 = vor.u32 1.1754944e-38, %v1950_v21 }
 0x2c0   :  { %v2072_v5 = vpop.eup %2071 }
 0x2c1   :  { %v2074_v55 = vpop.eup %2073  ;;  %v1906_v15 = vadd.f32 1.0, %v2072_v5 }
 0x2c2   :  { %v2076_v54 = vpop.eup %2075  ;;  %v3138_v63 = vadd.f32 1.0, %v2074_v55 }
 0x2c3   :  { %v2078_v31 = vpop.eup %2077  ;;  %v1910_v35 = vmul.f32 %v2076_v54, %v1905_v0  ;;  %2079 = vrcp.f32 %v1906_v15  ;;  %vm1915_vm12 = vweird.f32 %v2076_v54  ;;  %v1935_v49 = vand.u32 2147483648, %v1906_v15 }
 0x2c4   :  { %v1940_v61 = vmul.f32 %v2078_v31, %v1907_v40  ;;  %2081 = vrcp.f32 %v3138_v63  ;;  %vm1945_vm13 = vweird.f32 %v2078_v31  ;;  %vm1916_vm1 = vmor %vm1914_vm14, %vm1915_vm12  ;;  %v1965_v30 = vand.u32 2147483648, %v3138_v63 }
 0x2c5   :  { %v1911_v60 = vsub.f32 1.0, %v1910_v35  ;;  %vm1946_vm3 = vmor %vm1944_vm15, %vm1945_vm13  ;;  %v1933_v6 = vand.u32 2147483647, %v1906_v15  ;;  %v1963_v8 = vand.u32 2147483647, %v3138_v63  ;;  %vm1929_vm7 = vweird.f32 %v1906_v15 }
 0x2c6   :  { %v1941_v51 = vsub.f32 1.0, %v1940_v61  ;;  %vm1959_vm8 = vweird.f32 %v3138_v63  ;;  %v1936_v37 = vor.u32 1.1754944e-38, %v1935_v49  ;;  %v1966_v11 = vor.u32 1.1754944e-38, %v1965_v30 }
 0x2c7   :  { %v1912_v52 = vmul.f32 %v2076_v54, %v1911_v60  ;;  %vm1934_vm10 = vcmp.eq.f32.partialorder %v1933_v6, 8.507059e+37  ;;  %vm1964_vm12 = vcmp.eq.f32.partialorder %v1963_v8, 8.507059e+37 }
 0x2c8   :  { %v1942_v14 = vmul.f32 %v2078_v31, %v1941_v51 }
 0x2c9   :  { %v2080_v53 = vpop.eup %2079  ;;  %v1913_v32 = vadd.f32 %v2076_v54, %v1912_v52 }
 0x2ca   :  { %v2082_v20 = vpop.eup %2081  ;;  %v1925_v29 = vmul.f32 %v2080_v53, %v1906_v15  ;;  %v1943_v38 = vadd.f32 %v2078_v31, %v1942_v14  ;;  %vm1930_vm5 = vweird.f32 %v2080_v53 }
 0x2cb   :  { %v1955_v58 = vmul.f32 %v2082_v20, %v3138_v63  ;;  %v1917_v4 = vsel %vm1916_vm1, %v2076_v54, %v1913_v32  ;;  %vm1960_vm6 = vweird.f32 %v2082_v20  ;;  %vm1931_vm9 = vmor %vm1929_vm7, %vm1930_vm5 }
 0x2cc   :  { %v1926_v27 = vsub.f32 1.0, %v1925_v29  ;;  %v1922_v22 = vsel %vm1919_vm2, %v1921_v10, %v1917_v4  ;;  %v1947_v25 = vsel %vm1946_vm3, %v2078_v31, %v1943_v38  ;;  %vm1961_vm11 = vmor %vm1959_vm8, %vm1960_vm6 }
 0x2cd   :  { %v1956_v44 = vsub.f32 1.0, %v1955_v58  ;;  %v1952_v19 = vsel %vm1949_vm4, %v1951_v39, %v1947_v25  ;;  %v1973_v18 = vmul.f32 %v1969_v45, %v1922_v22 }
 0x2ce   :  { %v1927_v62 = vmul.f32 %v2080_v53, %v1926_v27  ;;  %v1975_v56 = vmul.f32 %v1971_v17, %v1952_v19 }
 0x2cf   :  { %v1957_v24 = vmul.f32 %v2082_v20, %v1956_v44  ;;  %1978 = vst.msk [vmem:[#allocation8] sm:$0xff] %vm1977_vm0, %v1973_v18 }
 0x2d0   :  { %v1928_v9 = vadd.f32 %v2080_v53, %v1927_v62  ;;  %1980 = vst.msk [vmem:[#allocation8 + $0x10] sm:$0xff] %vm1977_vm0, %v1975_v56 }
 0x2d1   :  { %v1958_v41 = vadd.f32 %v2082_v20, %v1957_v24 }
 0x2d2   :  { %v1932_v48 = vsel %vm1931_vm9, %v2080_v53, %v1928_v9 }
 0x2d3   :  { %v1937_v47 = vsel %vm1934_vm10, %v1936_v37, %v1932_v48  ;;  %v1962_v2 = vsel %vm1961_vm11, %v2082_v20, %v1958_v41 }
 0x2d4   :  { %v1967_v50 = vsel %vm1964_vm12, %v1966_v11, %v1962_v2  ;;  %v1974_v46 = vmul.f32 %v1970_v23, %v1937_v47 }
 0x2d5   :  { %v1976_v13 = vmul.f32 %v1972_v36, %v1967_v50 }
 0x2d6   :  { %1979 = vst.msk [vmem:[#allocation8 + $0x8] sm:$0xff] %vm1977_vm0, %v1974_v46 }
 0x2d7   :  { %1981 = vst.msk [vmem:[#allocation8 + $0x18] sm:$0xff] %vm1977_vm0, %v1976_v13 }
 0x2d8   :  { %1994 = dma.vmem_to_hbm [thread:$0]  %s1987_s1, 512, %s1989_s22, [#allocation5], %s2163_s18, %s2163_s18, %s2164_s19  }
 0x2d9   :  { %2159 = dma.done.wait [#allocation5], 512  }
 0x2da   :  { %2160 = vsyncadd [#allocation5], 4294966784 }
 0x2db   :  { %1999 = vsyncpa [#allocation4], 1 }
 0x2dc   :  { %2000 = vsyncpa [#allocation5], 1 }
 0x2dd   :  { %2001 = vsyncpa [#allocation6], 1 }

</bundles_post_ra>
